<compile_context>
chip_gen: v7x
topology: tpu7x:2x2x1
jax: 0.10.0
libtpu: 0.0.40
codegen_flags: <defaults>
</compile_context>

<pallas_src>
import functools

import jax
import jax.numpy as jnp
from jax.experimental import pallas as pl
from jax.experimental.pallas import tpu as pltpu


@functools.partial(jax.jit, static_argnames=("p_drop",))
def init_conv_forward(x_ncdhw, weight, bias, keep_mask_nc, p_drop):
    """x_ncdhw: (N, Cin, D, H, W) f32   weight: (Cout, Cin, 3, 3, 3)
       bias: (Cout,)   keep_mask_nc: (N, Cout) bool (dropout3d channel keep mask).
       Returns (N, Cout, D, H, W) f32."""
    N, Cin, D, H, W = x_ncdhw.shape
    Cout = weight.shape[0]

    Cp = 8                          # channels padded to a full sublane group
    Wp = W + 2                      # padded row pitch (lanes per h-row)
    L = H * Wp                      # lanes per output depth slice (incl. 2 seam lanes/row)
    DL = D * L                      # output lanes per (n, cout) row (640 = 5*128 here)
    C = (H + 3) * Wp                # slab lane extent (extra h-row so tap slices never OOB)
    R = (D + 2) * Cp                # slab rows: (padded depth, padded cin)
    K = 27 * Cp                     # fused contraction: (kh, kw, kd, cin_padded)

    # ---- wrapper glue: zero-pad + relayout only (no im2col blow-up) ----
    xpad = jnp.pad(x_ncdhw, ((0, 0), (0, Cp - Cin), (1, 1), (1, 2), (1, 1)))
    # (N, Cp, D+2, H+3, Wp) -> rows=(dp, c), lanes=(hp, wp)
    slab = jnp.transpose(xpad, (0, 2, 1, 3, 4)).reshape(N, R, C)

    # weight (Cout, Cin, kd, kh, kw) -> (Cout, kh, kw, kd, Cp) -> (Cout, 27*Cp)
    wpad = jnp.pad(weight, ((0, 0), (0, Cp - Cin), (0, 0), (0, 0), (0, 0)))
    wmat = jnp.transpose(wpad, (0, 3, 4, 2, 1)).reshape(Cout, K).astype(jnp.float32)

    bcol = bias.reshape(Cout, 1).astype(jnp.float32)
    scale = 1.0 / (1.0 - p_drop)
    mask = (keep_mask_nc.astype(jnp.float32) * scale).reshape(N, Cout, 1)

    def kernel(x_ref, w_ref, b_ref, m_ref, o_ref, rhs_ref):
        # Build the fused RHS (K, D*L): for every output depth d, the 9 (kh, kw)
        # lane-shifted views of the 3 needed (sublane-aligned) depth blocks.
        for d in range(D):
            block3 = x_ref[0, d * Cp:(d + 3) * Cp, :]        # (3*Cp, C), static, 8-aligned
            for kh in range(3):
                for kw in range(3):
                    shift = kh * Wp + kw
                    tap = kh * 3 + kw
                    rhs_ref[tap * 3 * Cp:(tap + 1) * 3 * Cp,
                            d * L:(d + 1) * L] = block3[:, shift:shift + L]
        # One MXU matmul per batch: (Cout, K) x (K, D*L) -> (Cout, D*L).
        acc = jnp.dot(w_ref[...], rhs_ref[...], preferred_element_type=jnp.float32)
        o_ref[0] = ((acc + b_ref[...]) * m_ref[0]).astype(o_ref.dtype)

    flops = 2 * N * Cout * K * DL
    bytes_accessed = 4 * (N * R * C + Cout * K + Cout + N * Cout + N * Cout * DL)

    out = pl.pallas_call(
        kernel,
        out_shape=jax.ShapeDtypeStruct((N, Cout, DL), jnp.float32),
        grid=(N,),
        in_specs=[
            pl.BlockSpec((1, R, C), lambda n: (n, 0, 0)),      # per-n slab, resident
            pl.BlockSpec((Cout, K), lambda n: (0, 0)),         # fused weights, resident
            pl.BlockSpec((Cout, 1), lambda n: (0, 0)),         # bias column
            pl.BlockSpec((1, Cout, 1), lambda n: (n, 0, 0)),   # per-n dropout keep*scale
        ],
        out_specs=pl.BlockSpec((1, Cout, DL), lambda n: (n, 0, 0)),
        scratch_shapes=[pltpu.VMEM((K, DL), jnp.float32)],
        compiler_params=pltpu.CompilerParams(
            dimension_semantics=("parallel",),
            vmem_limit_bytes=32 * 1024 * 1024),
        cost_estimate=pl.CostEstimate(flops=flops, transcendentals=0,
                                      bytes_accessed=bytes_accessed),
    )(slab, wmat, bcol, mask)

    # (N, Cout, D, H, Wp) -> strip the 2 seam lanes per h-row; already NCDHW order.
    return out.reshape(N, Cout, D, H, Wp)[..., :W]


if __name__ == "__main__":
    key = jax.random.PRNGKey(0)
    k_x, k_w, k_b, k_m = jax.random.split(key, 4)

    N, Cin, Cout, D, H, W = 2, 4, 16, 8, 8, 8
    p_drop = 0.2

    x = jax.random.normal(k_x, (N, Cin, D, H, W), jnp.float32)

    # Conv3d-style uniform(-1/sqrt(fan_in), +1/sqrt(fan_in)) init.
    fan_in = Cin * 27
    bound = 1.0 / (fan_in ** 0.5)
    weight = jax.random.uniform(k_w, (Cout, Cin, 3, 3, 3), jnp.float32, -bound, bound)
    bias = jax.random.uniform(k_b, (Cout,), jnp.float32, -bound, bound)

    # F.dropout3d (training=True default) drops whole (n, c) channels; the Bernoulli
    # keep mask is drawn here, zero/scale is applied in-kernel.
    keep_mask = jax.random.bernoulli(k_m, 1.0 - p_drop, (N, Cout))

    y = init_conv_forward(x, weight, bias, keep_mask, p_drop)
    y = jax.block_until_ready(y)
    assert y.shape == (N, Cout, D, H, W)

    # Reference: XLA conv + identical dropout mask.
    y_ref = jax.lax.conv_general_dilated(
        x, weight, window_strides=(1, 1, 1), padding=((1, 1),) * 3,
        dimension_numbers=("NCDHW", "OIDHW", "NCDHW"))
    y_ref = y_ref + bias[None, :, None, None, None]
    y_ref = y_ref * (keep_mask.astype(jnp.float32) / (1.0 - p_drop))[:, :, None, None, None]
    err = float(jnp.max(jnp.abs(y - y_ref)))
    assert jnp.allclose(y, y_ref, atol=2e-2, rtol=2e-2), err

    print("KERNEL_OK")
</pallas_src>

<mosaic_0001>
module attributes {stable_mosaic.version = 11 : i64} {
  func.func @kernel(%arg0: i32, %arg1: memref<1x80x110xf32, #tpu.memory_space<vmem>>, %arg2: memref<16x216xf32, #tpu.memory_space<vmem>>, %arg3: memref<16x1xf32, #tpu.memory_space<vmem>>, %arg4: memref<1x16x1xf32, #tpu.memory_space<vmem>>, %arg5: memref<1x16x640xf32, #tpu.memory_space<vmem>>, %arg6: memref<216x640xf32, #tpu.memory_space<vmem>>) attributes {dimension_semantics = [#tpu.dimension_semantics<parallel>], iteration_bounds = array<i64: 2>, scalar_prefetch = 0 : i64, scratch_operands = 1 : i64, tpu.core_type = #tpu.core_type<tc>, window_params = [{transform_indices = @transform_0, window_bounds = array<i64: 1, 80, 110>}, {pipeline_mode = #tpu.pipeline_mode<synchronous>, transform_indices = @transform_1, window_bounds = array<i64: 16, 216>}, {pipeline_mode = #tpu.pipeline_mode<synchronous>, transform_indices = @transform_2, window_bounds = array<i64: 16, 1>}, {transform_indices = @transform_3, window_bounds = array<i64: 1, 16, 1>}, {transform_indices = @transform_4, window_bounds = array<i64: 1, 16, 640>}]} {
    %c0 = arith.constant 0 : index
    %c0_0 = arith.constant 0 : index
    %c0_1 = arith.constant 0 : index
    %0 = vector.load %arg1[%c0, %c0_0, %c0_1] : memref<1x80x110xf32, #tpu.memory_space<vmem>>, vector<1x24x110xf32>
    %1 = vector.shape_cast %0 : vector<1x24x110xf32> to vector<24x110xf32>
    %2 = vector.extract_strided_slice %1 {offsets = [0, 0], sizes = [24, 80], strides = [1, 1]} : vector<24x110xf32> to vector<24x80xf32>
    %c0_2 = arith.constant 0 : index
    %c0_3 = arith.constant 0 : index
    %3 = vector.load %arg6[%c0_2, %c0_3] : memref<216x640xf32, #tpu.memory_space<vmem>>, vector<24x80xf32>
    tpu.vector_store %arg6[%c0_2, %c0_3], %2 {strides = array<i32>} : memref<216x640xf32, #tpu.memory_space<vmem>>, vector<24x80xf32>,
    %4 = vector.extract_strided_slice %1 {offsets = [0, 1], sizes = [24, 80], strides = [1, 1]} : vector<24x110xf32> to vector<24x80xf32>
    %c24 = arith.constant 24 : index
    %c0_4 = arith.constant 0 : index
    %5 = vector.load %arg6[%c24, %c0_4] : memref<216x640xf32, #tpu.memory_space<vmem>>, vector<24x80xf32>
    tpu.vector_store %arg6[%c24, %c0_4], %4 {strides = array<i32>} : memref<216x640xf32, #tpu.memory_space<vmem>>, vector<24x80xf32>,
    %6 = vector.extract_strided_slice %1 {offsets = [0, 2], sizes = [24, 80], strides = [1, 1]} : vector<24x110xf32> to vector<24x80xf32>
    %c48 = arith.constant 48 : index
    %c0_5 = arith.constant 0 : index
    %7 = vector.load %arg6[%c48, %c0_5] : memref<216x640xf32, #tpu.memory_space<vmem>>, vector<24x80xf32>
    tpu.vector_store %arg6[%c48, %c0_5], %6 {strides = array<i32>} : memref<216x640xf32, #tpu.memory_space<vmem>>, vector<24x80xf32>,
    %8 = vector.extract_strided_slice %1 {offsets = [0, 10], sizes = [24, 80], strides = [1, 1]} : vector<24x110xf32> to vector<24x80xf32>
    %c72 = arith.constant 72 : index
    %c0_6 = arith.constant 0 : index
    %9 = vector.load %arg6[%c72, %c0_6] : memref<216x640xf32, #tpu.memory_space<vmem>>, vector<24x80xf32>
    tpu.vector_store %arg6[%c72, %c0_6], %8 {strides = array<i32>} : memref<216x640xf32, #tpu.memory_space<vmem>>, vector<24x80xf32>,
    %10 = vector.extract_strided_slice %1 {offsets = [0, 11], sizes = [24, 80], strides = [1, 1]} : vector<24x110xf32> to vector<24x80xf32>
    %c96 = arith.constant 96 : index
    %c0_7 = arith.constant 0 : index
    %11 = vector.load %arg6[%c96, %c0_7] : memref<216x640xf32, #tpu.memory_space<vmem>>, vector<24x80xf32>
    tpu.vector_store %arg6[%c96, %c0_7], %10 {strides = array<i32>} : memref<216x640xf32, #tpu.memory_space<vmem>>, vector<24x80xf32>,
    %12 = vector.extract_strided_slice %1 {offsets = [0, 12], sizes = [24, 80], strides = [1, 1]} : vector<24x110xf32> to vector<24x80xf32>
    %c120 = arith.constant 120 : index
    %c0_8 = arith.constant 0 : index
    %13 = vector.load %arg6[%c120, %c0_8] : memref<216x640xf32, #tpu.memory_space<vmem>>, vector<24x80xf32>
    tpu.vector_store %arg6[%c120, %c0_8], %12 {strides = array<i32>} : memref<216x640xf32, #tpu.memory_space<vmem>>, vector<24x80xf32>,
    %14 = vector.extract_strided_slice %1 {offsets = [0, 20], sizes = [24, 80], strides = [1, 1]} : vector<24x110xf32> to vector<24x80xf32>
    %c144 = arith.constant 144 : index
    %c0_9 = arith.constant 0 : index
    %15 = vector.load %arg6[%c144, %c0_9] : memref<216x640xf32, #tpu.memory_space<vmem>>, vector<24x80xf32>
    tpu.vector_store %arg6[%c144, %c0_9], %14 {strides = array<i32>} : memref<216x640xf32, #tpu.memory_space<vmem>>, vector<24x80xf32>,
    %16 = vector.extract_strided_slice %1 {offsets = [0, 21], sizes = [24, 80], strides = [1, 1]} : vector<24x110xf32> to vector<24x80xf32>
    %c168 = arith.constant 168 : index
    %c0_10 = arith.constant 0 : index
    %17 = vector.load %arg6[%c168, %c0_10] : memref<216x640xf32, #tpu.memory_space<vmem>>, vector<24x80xf32>
    tpu.vector_store %arg6[%c168, %c0_10], %16 {strides = array<i32>} : memref<216x640xf32, #tpu.memory_space<vmem>>, vector<24x80xf32>,
    %18 = vector.extract_strided_slice %1 {offsets = [0, 22], sizes = [24, 80], strides = [1, 1]} : vector<24x110xf32> to vector<24x80xf32>
    %c192 = arith.constant 192 : index
    %c0_11 = arith.constant 0 : index
    %19 = vector.load %arg6[%c192, %c0_11] : memref<216x640xf32, #tpu.memory_space<vmem>>, vector<24x80xf32>
    tpu.vector_store %arg6[%c192, %c0_11], %18 {strides = array<i32>} : memref<216x640xf32, #tpu.memory_space<vmem>>, vector<24x80xf32>,
    %c0_12 = arith.constant 0 : index
    %c8 = arith.constant 8 : index
    %c0_13 = arith.constant 0 : index
    %20 = vector.load %arg1[%c0_12, %c8, %c0_13] : memref<1x80x110xf32, #tpu.memory_space<vmem>>, vector<1x24x110xf32>
    %21 = vector.shape_cast %20 : vector<1x24x110xf32> to vector<24x110xf32>
    %22 = vector.extract_strided_slice %21 {offsets = [0, 0], sizes = [24, 80], strides = [1, 1]} : vector<24x110xf32> to vector<24x80xf32>
    %c0_14 = arith.constant 0 : index
    %c80 = arith.constant 80 : index
    %23 = vector.load %arg6[%c0_14, %c80] : memref<216x640xf32, #tpu.memory_space<vmem>>, vector<24x80xf32>
    tpu.vector_store %arg6[%c0_14, %c80], %22 {strides = array<i32>} : memref<216x640xf32, #tpu.memory_space<vmem>>, vector<24x80xf32>,
    %24 = vector.extract_strided_slice %21 {offsets = [0, 1], sizes = [24, 80], strides = [1, 1]} : vector<24x110xf32> to vector<24x80xf32>
    %c24_15 = arith.constant 24 : index
    %c80_16 = arith.constant 80 : index
    %25 = vector.load %arg6[%c24_15, %c80_16] : memref<216x640xf32, #tpu.memory_space<vmem>>, vector<24x80xf32>
    tpu.vector_store %arg6[%c24_15, %c80_16], %24 {strides = array<i32>} : memref<216x640xf32, #tpu.memory_space<vmem>>, vector<24x80xf32>,
    %26 = vector.extract_strided_slice %21 {offsets = [0, 2], sizes = [24, 80], strides = [1, 1]} : vector<24x110xf32> to vector<24x80xf32>
    %c48_17 = arith.constant 48 : index
    %c80_18 = arith.constant 80 : index
    %27 = vector.load %arg6[%c48_17, %c80_18] : memref<216x640xf32, #tpu.memory_space<vmem>>, vector<24x80xf32>
    tpu.vector_store %arg6[%c48_17, %c80_18], %26 {strides = array<i32>} : memref<216x640xf32, #tpu.memory_space<vmem>>, vector<24x80xf32>,
    %28 = vector.extract_strided_slice %21 {offsets = [0, 10], sizes = [24, 80], strides = [1, 1]} : vector<24x110xf32> to vector<24x80xf32>
    %c72_19 = arith.constant 72 : index
    %c80_20 = arith.constant 80 : index
    %29 = vector.load %arg6[%c72_19, %c80_20] : memref<216x640xf32, #tpu.memory_space<vmem>>, vector<24x80xf32>
    tpu.vector_store %arg6[%c72_19, %c80_20], %28 {strides = array<i32>} : memref<216x640xf32, #tpu.memory_space<vmem>>, vector<24x80xf32>,
    %30 = vector.extract_strided_slice %21 {offsets = [0, 11], sizes = [24, 80], strides = [1, 1]} : vector<24x110xf32> to vector<24x80xf32>
    %c96_21 = arith.constant 96 : index
    %c80_22 = arith.constant 80 : index
    %31 = vector.load %arg6[%c96_21, %c80_22] : memref<216x640xf32, #tpu.memory_space<vmem>>, vector<24x80xf32>
    tpu.vector_store %arg6[%c96_21, %c80_22], %30 {strides = array<i32>} : memref<216x640xf32, #tpu.memory_space<vmem>>, vector<24x80xf32>,
    %32 = vector.extract_strided_slice %21 {offsets = [0, 12], sizes = [24, 80], strides = [1, 1]} : vector<24x110xf32> to vector<24x80xf32>
    %c120_23 = arith.constant 120 : index
    %c80_24 = arith.constant 80 : index
    %33 = vector.load %arg6[%c120_23, %c80_24] : memref<216x640xf32, #tpu.memory_space<vmem>>, vector<24x80xf32>
    tpu.vector_store %arg6[%c120_23, %c80_24], %32 {strides = array<i32>} : memref<216x640xf32, #tpu.memory_space<vmem>>, vector<24x80xf32>,
    %34 = vector.extract_strided_slice %21 {offsets = [0, 20], sizes = [24, 80], strides = [1, 1]} : vector<24x110xf32> to vector<24x80xf32>
    %c144_25 = arith.constant 144 : index
    %c80_26 = arith.constant 80 : index
    %35 = vector.load %arg6[%c144_25, %c80_26] : memref<216x640xf32, #tpu.memory_space<vmem>>, vector<24x80xf32>
    tpu.vector_store %arg6[%c144_25, %c80_26], %34 {strides = array<i32>} : memref<216x640xf32, #tpu.memory_space<vmem>>, vector<24x80xf32>,
    %36 = vector.extract_strided_slice %21 {offsets = [0, 21], sizes = [24, 80], strides = [1, 1]} : vector<24x110xf32> to vector<24x80xf32>
    %c168_27 = arith.constant 168 : index
    %c80_28 = arith.constant 80 : index
    %37 = vector.load %arg6[%c168_27, %c80_28] : memref<216x640xf32, #tpu.memory_space<vmem>>, vector<24x80xf32>
    tpu.vector_store %arg6[%c168_27, %c80_28], %36 {strides = array<i32>} : memref<216x640xf32, #tpu.memory_space<vmem>>, vector<24x80xf32>,
    %38 = vector.extract_strided_slice %21 {offsets = [0, 22], sizes = [24, 80], strides = [1, 1]} : vector<24x110xf32> to vector<24x80xf32>
    %c192_29 = arith.constant 192 : index
    %c80_30 = arith.constant 80 : index
    %39 = vector.load %arg6[%c192_29, %c80_30] : memref<216x640xf32, #tpu.memory_space<vmem>>, vector<24x80xf32>
    tpu.vector_store %arg6[%c192_29, %c80_30], %38 {strides = array<i32>} : memref<216x640xf32, #tpu.memory_space<vmem>>, vector<24x80xf32>,
    %c0_31 = arith.constant 0 : index
    %c16 = arith.constant 16 : index
    %c0_32 = arith.constant 0 : index
    %40 = vector.load %arg1[%c0_31, %c16, %c0_32] : memref<1x80x110xf32, #tpu.memory_space<vmem>>, vector<1x24x110xf32>
    %41 = vector.shape_cast %40 : vector<1x24x110xf32> to vector<24x110xf32>
    %42 = vector.extract_strided_slice %41 {offsets = [0, 0], sizes = [24, 80], strides = [1, 1]} : vector<24x110xf32> to vector<24x80xf32>
    %c0_33 = arith.constant 0 : index
    %c160 = arith.constant 160 : index
    %43 = vector.load %arg6[%c0_33, %c160] : memref<216x640xf32, #tpu.memory_space<vmem>>, vector<24x80xf32>
    tpu.vector_store %arg6[%c0_33, %c160], %42 {strides = array<i32>} : memref<216x640xf32, #tpu.memory_space<vmem>>, vector<24x80xf32>,
    %44 = vector.extract_strided_slice %41 {offsets = [0, 1], sizes = [24, 80], strides = [1, 1]} : vector<24x110xf32> to vector<24x80xf32>
    %c24_34 = arith.constant 24 : index
    %c160_35 = arith.constant 160 : index
    %45 = vector.load %arg6[%c24_34, %c160_35] : memref<216x640xf32, #tpu.memory_space<vmem>>, vector<24x80xf32>
    tpu.vector_store %arg6[%c24_34, %c160_35], %44 {strides = array<i32>} : memref<216x640xf32, #tpu.memory_space<vmem>>, vector<24x80xf32>,
    %46 = vector.extract_strided_slice %41 {offsets = [0, 2], sizes = [24, 80], strides = [1, 1]} : vector<24x110xf32> to vector<24x80xf32>
    %c48_36 = arith.constant 48 : index
    %c160_37 = arith.constant 160 : index
    %47 = vector.load %arg6[%c48_36, %c160_37] : memref<216x640xf32, #tpu.memory_space<vmem>>, vector<24x80xf32>
    tpu.vector_store %arg6[%c48_36, %c160_37], %46 {strides = array<i32>} : memref<216x640xf32, #tpu.memory_space<vmem>>, vector<24x80xf32>,
    %48 = vector.extract_strided_slice %41 {offsets = [0, 10], sizes = [24, 80], strides = [1, 1]} : vector<24x110xf32> to vector<24x80xf32>
    %c72_38 = arith.constant 72 : index
    %c160_39 = arith.constant 160 : index
    %49 = vector.load %arg6[%c72_38, %c160_39] : memref<216x640xf32, #tpu.memory_space<vmem>>, vector<24x80xf32>
    tpu.vector_store %arg6[%c72_38, %c160_39], %48 {strides = array<i32>} : memref<216x640xf32, #tpu.memory_space<vmem>>, vector<24x80xf32>,
    %50 = vector.extract_strided_slice %41 {offsets = [0, 11], sizes = [24, 80], strides = [1, 1]} : vector<24x110xf32> to vector<24x80xf32>
    %c96_40 = arith.constant 96 : index
    %c160_41 = arith.constant 160 : index
    %51 = vector.load %arg6[%c96_40, %c160_41] : memref<216x640xf32, #tpu.memory_space<vmem>>, vector<24x80xf32>
    tpu.vector_store %arg6[%c96_40, %c160_41], %50 {strides = array<i32>} : memref<216x640xf32, #tpu.memory_space<vmem>>, vector<24x80xf32>,
    %52 = vector.extract_strided_slice %41 {offsets = [0, 12], sizes = [24, 80], strides = [1, 1]} : vector<24x110xf32> to vector<24x80xf32>
    %c120_42 = arith.constant 120 : index
    %c160_43 = arith.constant 160 : index
    %53 = vector.load %arg6[%c120_42, %c160_43] : memref<216x640xf32, #tpu.memory_space<vmem>>, vector<24x80xf32>
    tpu.vector_store %arg6[%c120_42, %c160_43], %52 {strides = array<i32>} : memref<216x640xf32, #tpu.memory_space<vmem>>, vector<24x80xf32>,
    %54 = vector.extract_strided_slice %41 {offsets = [0, 20], sizes = [24, 80], strides = [1, 1]} : vector<24x110xf32> to vector<24x80xf32>
    %c144_44 = arith.constant 144 : index
    %c160_45 = arith.constant 160 : index
    %55 = vector.load %arg6[%c144_44, %c160_45] : memref<216x640xf32, #tpu.memory_space<vmem>>, vector<24x80xf32>
    tpu.vector_store %arg6[%c144_44, %c160_45], %54 {strides = array<i32>} : memref<216x640xf32, #tpu.memory_space<vmem>>, vector<24x80xf32>,
    %56 = vector.extract_strided_slice %41 {offsets = [0, 21], sizes = [24, 80], strides = [1, 1]} : vector<24x110xf32> to vector<24x80xf32>
    %c168_46 = arith.constant 168 : index
    %c160_47 = arith.constant 160 : index
    %57 = vector.load %arg6[%c168_46, %c160_47] : memref<216x640xf32, #tpu.memory_space<vmem>>, vector<24x80xf32>
    tpu.vector_store %arg6[%c168_46, %c160_47], %56 {strides = array<i32>} : memref<216x640xf32, #tpu.memory_space<vmem>>, vector<24x80xf32>,
    %58 = vector.extract_strided_slice %41 {offsets = [0, 22], sizes = [24, 80], strides = [1, 1]} : vector<24x110xf32> to vector<24x80xf32>
    %c192_48 = arith.constant 192 : index
    %c160_49 = arith.constant 160 : index
    %59 = vector.load %arg6[%c192_48, %c160_49] : memref<216x640xf32, #tpu.memory_space<vmem>>, vector<24x80xf32>
    tpu.vector_store %arg6[%c192_48, %c160_49], %58 {strides = array<i32>} : memref<216x640xf32, #tpu.memory_space<vmem>>, vector<24x80xf32>,
    %c0_50 = arith.constant 0 : index
    %c24_51 = arith.constant 24 : index
    %c0_52 = arith.constant 0 : index
    %60 = vector.load %arg1[%c0_50, %c24_51, %c0_52] : memref<1x80x110xf32, #tpu.memory_space<vmem>>, vector<1x24x110xf32>
    %61 = vector.shape_cast %60 : vector<1x24x110xf32> to vector<24x110xf32>
    %62 = vector.extract_strided_slice %61 {offsets = [0, 0], sizes = [24, 80], strides = [1, 1]} : vector<24x110xf32> to vector<24x80xf32>
    %c0_53 = arith.constant 0 : index
    %c240 = arith.constant 240 : index
    %63 = vector.load %arg6[%c0_53, %c240] : memref<216x640xf32, #tpu.memory_space<vmem>>, vector<24x80xf32>
    tpu.vector_store %arg6[%c0_53, %c240], %62 {strides = array<i32>} : memref<216x640xf32, #tpu.memory_space<vmem>>, vector<24x80xf32>,
    %64 = vector.extract_strided_slice %61 {offsets = [0, 1], sizes = [24, 80], strides = [1, 1]} : vector<24x110xf32> to vector<24x80xf32>
    %c24_54 = arith.constant 24 : index
    %c240_55 = arith.constant 240 : index
    %65 = vector.load %arg6[%c24_54, %c240_55] : memref<216x640xf32, #tpu.memory_space<vmem>>, vector<24x80xf32>
    tpu.vector_store %arg6[%c24_54, %c240_55], %64 {strides = array<i32>} : memref<216x640xf32, #tpu.memory_space<vmem>>, vector<24x80xf32>,
    %66 = vector.extract_strided_slice %61 {offsets = [0, 2], sizes = [24, 80], strides = [1, 1]} : vector<24x110xf32> to vector<24x80xf32>
    %c48_56 = arith.constant 48 : index
    %c240_57 = arith.constant 240 : index
    %67 = vector.load %arg6[%c48_56, %c240_57] : memref<216x640xf32, #tpu.memory_space<vmem>>, vector<24x80xf32>
    tpu.vector_store %arg6[%c48_56, %c240_57], %66 {strides = array<i32>} : memref<216x640xf32, #tpu.memory_space<vmem>>, vector<24x80xf32>,
    %68 = vector.extract_strided_slice %61 {offsets = [0, 10], sizes = [24, 80], strides = [1, 1]} : vector<24x110xf32> to vector<24x80xf32>
    %c72_58 = arith.constant 72 : index
    %c240_59 = arith.constant 240 : index
    %69 = vector.load %arg6[%c72_58, %c240_59] : memref<216x640xf32, #tpu.memory_space<vmem>>, vector<24x80xf32>
    tpu.vector_store %arg6[%c72_58, %c240_59], %68 {strides = array<i32>} : memref<216x640xf32, #tpu.memory_space<vmem>>, vector<24x80xf32>,
    %70 = vector.extract_strided_slice %61 {offsets = [0, 11], sizes = [24, 80], strides = [1, 1]} : vector<24x110xf32> to vector<24x80xf32>
    %c96_60 = arith.constant 96 : index
    %c240_61 = arith.constant 240 : index
    %71 = vector.load %arg6[%c96_60, %c240_61] : memref<216x640xf32, #tpu.memory_space<vmem>>, vector<24x80xf32>
    tpu.vector_store %arg6[%c96_60, %c240_61], %70 {strides = array<i32>} : memref<216x640xf32, #tpu.memory_space<vmem>>, vector<24x80xf32>,
    %72 = vector.extract_strided_slice %61 {offsets = [0, 12], sizes = [24, 80], strides = [1, 1]} : vector<24x110xf32> to vector<24x80xf32>
    %c120_62 = arith.constant 120 : index
    %c240_63 = arith.constant 240 : index
    %73 = vector.load %arg6[%c120_62, %c240_63] : memref<216x640xf32, #tpu.memory_space<vmem>>, vector<24x80xf32>
    tpu.vector_store %arg6[%c120_62, %c240_63], %72 {strides = array<i32>} : memref<216x640xf32, #tpu.memory_space<vmem>>, vector<24x80xf32>,
    %74 = vector.extract_strided_slice %61 {offsets = [0, 20], sizes = [24, 80], strides = [1, 1]} : vector<24x110xf32> to vector<24x80xf32>
    %c144_64 = arith.constant 144 : index
    %c240_65 = arith.constant 240 : index
    %75 = vector.load %arg6[%c144_64, %c240_65] : memref<216x640xf32, #tpu.memory_space<vmem>>, vector<24x80xf32>
    tpu.vector_store %arg6[%c144_64, %c240_65], %74 {strides = array<i32>} : memref<216x640xf32, #tpu.memory_space<vmem>>, vector<24x80xf32>,
    %76 = vector.extract_strided_slice %61 {offsets = [0, 21], sizes = [24, 80], strides = [1, 1]} : vector<24x110xf32> to vector<24x80xf32>
    %c168_66 = arith.constant 168 : index
    %c240_67 = arith.constant 240 : index
    %77 = vector.load %arg6[%c168_66, %c240_67] : memref<216x640xf32, #tpu.memory_space<vmem>>, vector<24x80xf32>
    tpu.vector_store %arg6[%c168_66, %c240_67], %76 {strides = array<i32>} : memref<216x640xf32, #tpu.memory_space<vmem>>, vector<24x80xf32>,
    %78 = vector.extract_strided_slice %61 {offsets = [0, 22], sizes = [24, 80], strides = [1, 1]} : vector<24x110xf32> to vector<24x80xf32>
    %c192_68 = arith.constant 192 : index
    %c240_69 = arith.constant 240 : index
    %79 = vector.load %arg6[%c192_68, %c240_69] : memref<216x640xf32, #tpu.memory_space<vmem>>, vector<24x80xf32>
    tpu.vector_store %arg6[%c192_68, %c240_69], %78 {strides = array<i32>} : memref<216x640xf32, #tpu.memory_space<vmem>>, vector<24x80xf32>,
    %c0_70 = arith.constant 0 : index
    %c32 = arith.constant 32 : index
    %c0_71 = arith.constant 0 : index
    %80 = vector.load %arg1[%c0_70, %c32, %c0_71] : memref<1x80x110xf32, #tpu.memory_space<vmem>>, vector<1x24x110xf32>
    %81 = vector.shape_cast %80 : vector<1x24x110xf32> to vector<24x110xf32>
    %82 = vector.extract_strided_slice %81 {offsets = [0, 0], sizes = [24, 80], strides = [1, 1]} : vector<24x110xf32> to vector<24x80xf32>
    %c0_72 = arith.constant 0 : index
    %c320 = arith.constant 320 : index
    %83 = vector.load %arg6[%c0_72, %c320] : memref<216x640xf32, #tpu.memory_space<vmem>>, vector<24x80xf32>
    tpu.vector_store %arg6[%c0_72, %c320], %82 {strides = array<i32>} : memref<216x640xf32, #tpu.memory_space<vmem>>, vector<24x80xf32>,
    %84 = vector.extract_strided_slice %81 {offsets = [0, 1], sizes = [24, 80], strides = [1, 1]} : vector<24x110xf32> to vector<24x80xf32>
    %c24_73 = arith.constant 24 : index
    %c320_74 = arith.constant 320 : index
    %85 = vector.load %arg6[%c24_73, %c320_74] : memref<216x640xf32, #tpu.memory_space<vmem>>, vector<24x80xf32>
    tpu.vector_store %arg6[%c24_73, %c320_74], %84 {strides = array<i32>} : memref<216x640xf32, #tpu.memory_space<vmem>>, vector<24x80xf32>,
    %86 = vector.extract_strided_slice %81 {offsets = [0, 2], sizes = [24, 80], strides = [1, 1]} : vector<24x110xf32> to vector<24x80xf32>
    %c48_75 = arith.constant 48 : index
    %c320_76 = arith.constant 320 : index
    %87 = vector.load %arg6[%c48_75, %c320_76] : memref<216x640xf32, #tpu.memory_space<vmem>>, vector<24x80xf32>
    tpu.vector_store %arg6[%c48_75, %c320_76], %86 {strides = array<i32>} : memref<216x640xf32, #tpu.memory_space<vmem>>, vector<24x80xf32>,
    %88 = vector.extract_strided_slice %81 {offsets = [0, 10], sizes = [24, 80], strides = [1, 1]} : vector<24x110xf32> to vector<24x80xf32>
    %c72_77 = arith.constant 72 : index
    %c320_78 = arith.constant 320 : index
    %89 = vector.load %arg6[%c72_77, %c320_78] : memref<216x640xf32, #tpu.memory_space<vmem>>, vector<24x80xf32>
    tpu.vector_store %arg6[%c72_77, %c320_78], %88 {strides = array<i32>} : memref<216x640xf32, #tpu.memory_space<vmem>>, vector<24x80xf32>,
    %90 = vector.extract_strided_slice %81 {offsets = [0, 11], sizes = [24, 80], strides = [1, 1]} : vector<24x110xf32> to vector<24x80xf32>
    %c96_79 = arith.constant 96 : index
    %c320_80 = arith.constant 320 : index
    %91 = vector.load %arg6[%c96_79, %c320_80] : memref<216x640xf32, #tpu.memory_space<vmem>>, vector<24x80xf32>
    tpu.vector_store %arg6[%c96_79, %c320_80], %90 {strides = array<i32>} : memref<216x640xf32, #tpu.memory_space<vmem>>, vector<24x80xf32>,
    %92 = vector.extract_strided_slice %81 {offsets = [0, 12], sizes = [24, 80], strides = [1, 1]} : vector<24x110xf32> to vector<24x80xf32>
    %c120_81 = arith.constant 120 : index
    %c320_82 = arith.constant 320 : index
    %93 = vector.load %arg6[%c120_81, %c320_82] : memref<216x640xf32, #tpu.memory_space<vmem>>, vector<24x80xf32>
    tpu.vector_store %arg6[%c120_81, %c320_82], %92 {strides = array<i32>} : memref<216x640xf32, #tpu.memory_space<vmem>>, vector<24x80xf32>,
    %94 = vector.extract_strided_slice %81 {offsets = [0, 20], sizes = [24, 80], strides = [1, 1]} : vector<24x110xf32> to vector<24x80xf32>
    %c144_83 = arith.constant 144 : index
    %c320_84 = arith.constant 320 : index
    %95 = vector.load %arg6[%c144_83, %c320_84] : memref<216x640xf32, #tpu.memory_space<vmem>>, vector<24x80xf32>
    tpu.vector_store %arg6[%c144_83, %c320_84], %94 {strides = array<i32>} : memref<216x640xf32, #tpu.memory_space<vmem>>, vector<24x80xf32>,
    %96 = vector.extract_strided_slice %81 {offsets = [0, 21], sizes = [24, 80], strides = [1, 1]} : vector<24x110xf32> to vector<24x80xf32>
    %c168_85 = arith.constant 168 : index
    %c320_86 = arith.constant 320 : index
    %97 = vector.load %arg6[%c168_85, %c320_86] : memref<216x640xf32, #tpu.memory_space<vmem>>, vector<24x80xf32>
    tpu.vector_store %arg6[%c168_85, %c320_86], %96 {strides = array<i32>} : memref<216x640xf32, #tpu.memory_space<vmem>>, vector<24x80xf32>,
    %98 = vector.extract_strided_slice %81 {offsets = [0, 22], sizes = [24, 80], strides = [1, 1]} : vector<24x110xf32> to vector<24x80xf32>
    %c192_87 = arith.constant 192 : index
    %c320_88 = arith.constant 320 : index
    %99 = vector.load %arg6[%c192_87, %c320_88] : memref<216x640xf32, #tpu.memory_space<vmem>>, vector<24x80xf32>
    tpu.vector_store %arg6[%c192_87, %c320_88], %98 {strides = array<i32>} : memref<216x640xf32, #tpu.memory_space<vmem>>, vector<24x80xf32>,
    %c0_89 = arith.constant 0 : index
    %c40 = arith.constant 40 : index
    %c0_90 = arith.constant 0 : index
    %100 = vector.load %arg1[%c0_89, %c40, %c0_90] : memref<1x80x110xf32, #tpu.memory_space<vmem>>, vector<1x24x110xf32>
    %101 = vector.shape_cast %100 : vector<1x24x110xf32> to vector<24x110xf32>
    %102 = vector.extract_strided_slice %101 {offsets = [0, 0], sizes = [24, 80], strides = [1, 1]} : vector<24x110xf32> to vector<24x80xf32>
    %c0_91 = arith.constant 0 : index
    %c400 = arith.constant 400 : index
    %103 = vector.load %arg6[%c0_91, %c400] : memref<216x640xf32, #tpu.memory_space<vmem>>, vector<24x80xf32>
    tpu.vector_store %arg6[%c0_91, %c400], %102 {strides = array<i32>} : memref<216x640xf32, #tpu.memory_space<vmem>>, vector<24x80xf32>,
    %104 = vector.extract_strided_slice %101 {offsets = [0, 1], sizes = [24, 80], strides = [1, 1]} : vector<24x110xf32> to vector<24x80xf32>
    %c24_92 = arith.constant 24 : index
    %c400_93 = arith.constant 400 : index
    %105 = vector.load %arg6[%c24_92, %c400_93] : memref<216x640xf32, #tpu.memory_space<vmem>>, vector<24x80xf32>
    tpu.vector_store %arg6[%c24_92, %c400_93], %104 {strides = array<i32>} : memref<216x640xf32, #tpu.memory_space<vmem>>, vector<24x80xf32>,
    %106 = vector.extract_strided_slice %101 {offsets = [0, 2], sizes = [24, 80], strides = [1, 1]} : vector<24x110xf32> to vector<24x80xf32>
    %c48_94 = arith.constant 48 : index
    %c400_95 = arith.constant 400 : index
    %107 = vector.load %arg6[%c48_94, %c400_95] : memref<216x640xf32, #tpu.memory_space<vmem>>, vector<24x80xf32>
    tpu.vector_store %arg6[%c48_94, %c400_95], %106 {strides = array<i32>} : memref<216x640xf32, #tpu.memory_space<vmem>>, vector<24x80xf32>,
    %108 = vector.extract_strided_slice %101 {offsets = [0, 10], sizes = [24, 80], strides = [1, 1]} : vector<24x110xf32> to vector<24x80xf32>
    %c72_96 = arith.constant 72 : index
    %c400_97 = arith.constant 400 : index
    %109 = vector.load %arg6[%c72_96, %c400_97] : memref<216x640xf32, #tpu.memory_space<vmem>>, vector<24x80xf32>
    tpu.vector_store %arg6[%c72_96, %c400_97], %108 {strides = array<i32>} : memref<216x640xf32, #tpu.memory_space<vmem>>, vector<24x80xf32>,
    %110 = vector.extract_strided_slice %101 {offsets = [0, 11], sizes = [24, 80], strides = [1, 1]} : vector<24x110xf32> to vector<24x80xf32>
    %c96_98 = arith.constant 96 : index
    %c400_99 = arith.constant 400 : index
    %111 = vector.load %arg6[%c96_98, %c400_99] : memref<216x640xf32, #tpu.memory_space<vmem>>, vector<24x80xf32>
    tpu.vector_store %arg6[%c96_98, %c400_99], %110 {strides = array<i32>} : memref<216x640xf32, #tpu.memory_space<vmem>>, vector<24x80xf32>,
    %112 = vector.extract_strided_slice %101 {offsets = [0, 12], sizes = [24, 80], strides = [1, 1]} : vector<24x110xf32> to vector<24x80xf32>
    %c120_100 = arith.constant 120 : index
    %c400_101 = arith.constant 400 : index
    %113 = vector.load %arg6[%c120_100, %c400_101] : memref<216x640xf32, #tpu.memory_space<vmem>>, vector<24x80xf32>
    tpu.vector_store %arg6[%c120_100, %c400_101], %112 {strides = array<i32>} : memref<216x640xf32, #tpu.memory_space<vmem>>, vector<24x80xf32>,
    %114 = vector.extract_strided_slice %101 {offsets = [0, 20], sizes = [24, 80], strides = [1, 1]} : vector<24x110xf32> to vector<24x80xf32>
    %c144_102 = arith.constant 144 : index
    %c400_103 = arith.constant 400 : index
    %115 = vector.load %arg6[%c144_102, %c400_103] : memref<216x640xf32, #tpu.memory_space<vmem>>, vector<24x80xf32>
    tpu.vector_store %arg6[%c144_102, %c400_103], %114 {strides = array<i32>} : memref<216x640xf32, #tpu.memory_space<vmem>>, vector<24x80xf32>,
    %116 = vector.extract_strided_slice %101 {offsets = [0, 21], sizes = [24, 80], strides = [1, 1]} : vector<24x110xf32> to vector<24x80xf32>
    %c168_104 = arith.constant 168 : index
    %c400_105 = arith.constant 400 : index
    %117 = vector.load %arg6[%c168_104, %c400_105] : memref<216x640xf32, #tpu.memory_space<vmem>>, vector<24x80xf32>
    tpu.vector_store %arg6[%c168_104, %c400_105], %116 {strides = array<i32>} : memref<216x640xf32, #tpu.memory_space<vmem>>, vector<24x80xf32>,
    %118 = vector.extract_strided_slice %101 {offsets = [0, 22], sizes = [24, 80], strides = [1, 1]} : vector<24x110xf32> to vector<24x80xf32>
    %c192_106 = arith.constant 192 : index
    %c400_107 = arith.constant 400 : index
    %119 = vector.load %arg6[%c192_106, %c400_107] : memref<216x640xf32, #tpu.memory_space<vmem>>, vector<24x80xf32>
    tpu.vector_store %arg6[%c192_106, %c400_107], %118 {strides = array<i32>} : memref<216x640xf32, #tpu.memory_space<vmem>>, vector<24x80xf32>,
    %c0_108 = arith.constant 0 : index
    %c48_109 = arith.constant 48 : index
    %c0_110 = arith.constant 0 : index
    %120 = vector.load %arg1[%c0_108, %c48_109, %c0_110] : memref<1x80x110xf32, #tpu.memory_space<vmem>>, vector<1x24x110xf32>
    %121 = vector.shape_cast %120 : vector<1x24x110xf32> to vector<24x110xf32>
    %122 = vector.extract_strided_slice %121 {offsets = [0, 0], sizes = [24, 80], strides = [1, 1]} : vector<24x110xf32> to vector<24x80xf32>
    %c0_111 = arith.constant 0 : index
    %c480 = arith.constant 480 : index
    %123 = vector.load %arg6[%c0_111, %c480] : memref<216x640xf32, #tpu.memory_space<vmem>>, vector<24x80xf32>
    tpu.vector_store %arg6[%c0_111, %c480], %122 {strides = array<i32>} : memref<216x640xf32, #tpu.memory_space<vmem>>, vector<24x80xf32>,
    %124 = vector.extract_strided_slice %121 {offsets = [0, 1], sizes = [24, 80], strides = [1, 1]} : vector<24x110xf32> to vector<24x80xf32>
    %c24_112 = arith.constant 24 : index
    %c480_113 = arith.constant 480 : index
    %125 = vector.load %arg6[%c24_112, %c480_113] : memref<216x640xf32, #tpu.memory_space<vmem>>, vector<24x80xf32>
    tpu.vector_store %arg6[%c24_112, %c480_113], %124 {strides = array<i32>} : memref<216x640xf32, #tpu.memory_space<vmem>>, vector<24x80xf32>,
    %126 = vector.extract_strided_slice %121 {offsets = [0, 2], sizes = [24, 80], strides = [1, 1]} : vector<24x110xf32> to vector<24x80xf32>
    %c48_114 = arith.constant 48 : index
    %c480_115 = arith.constant 480 : index
    %127 = vector.load %arg6[%c48_114, %c480_115] : memref<216x640xf32, #tpu.memory_space<vmem>>, vector<24x80xf32>
    tpu.vector_store %arg6[%c48_114, %c480_115], %126 {strides = array<i32>} : memref<216x640xf32, #tpu.memory_space<vmem>>, vector<24x80xf32>,
    %128 = vector.extract_strided_slice %121 {offsets = [0, 10], sizes = [24, 80], strides = [1, 1]} : vector<24x110xf32> to vector<24x80xf32>
    %c72_116 = arith.constant 72 : index
    %c480_117 = arith.constant 480 : index
    %129 = vector.load %arg6[%c72_116, %c480_117] : memref<216x640xf32, #tpu.memory_space<vmem>>, vector<24x80xf32>
    tpu.vector_store %arg6[%c72_116, %c480_117], %128 {strides = array<i32>} : memref<216x640xf32, #tpu.memory_space<vmem>>, vector<24x80xf32>,
    %130 = vector.extract_strided_slice %121 {offsets = [0, 11], sizes = [24, 80], strides = [1, 1]} : vector<24x110xf32> to vector<24x80xf32>
    %c96_118 = arith.constant 96 : index
    %c480_119 = arith.constant 480 : index
    %131 = vector.load %arg6[%c96_118, %c480_119] : memref<216x640xf32, #tpu.memory_space<vmem>>, vector<24x80xf32>
    tpu.vector_store %arg6[%c96_118, %c480_119], %130 {strides = array<i32>} : memref<216x640xf32, #tpu.memory_space<vmem>>, vector<24x80xf32>,
    %132 = vector.extract_strided_slice %121 {offsets = [0, 12], sizes = [24, 80], strides = [1, 1]} : vector<24x110xf32> to vector<24x80xf32>
    %c120_120 = arith.constant 120 : index
    %c480_121 = arith.constant 480 : index
    %133 = vector.load %arg6[%c120_120, %c480_121] : memref<216x640xf32, #tpu.memory_space<vmem>>, vector<24x80xf32>
    tpu.vector_store %arg6[%c120_120, %c480_121], %132 {strides = array<i32>} : memref<216x640xf32, #tpu.memory_space<vmem>>, vector<24x80xf32>,
    %134 = vector.extract_strided_slice %121 {offsets = [0, 20], sizes = [24, 80], strides = [1, 1]} : vector<24x110xf32> to vector<24x80xf32>
    %c144_122 = arith.constant 144 : index
    %c480_123 = arith.constant 480 : index
    %135 = vector.load %arg6[%c144_122, %c480_123] : memref<216x640xf32, #tpu.memory_space<vmem>>, vector<24x80xf32>
    tpu.vector_store %arg6[%c144_122, %c480_123], %134 {strides = array<i32>} : memref<216x640xf32, #tpu.memory_space<vmem>>, vector<24x80xf32>,
    %136 = vector.extract_strided_slice %121 {offsets = [0, 21], sizes = [24, 80], strides = [1, 1]} : vector<24x110xf32> to vector<24x80xf32>
    %c168_124 = arith.constant 168 : index
    %c480_125 = arith.constant 480 : index
    %137 = vector.load %arg6[%c168_124, %c480_125] : memref<216x640xf32, #tpu.memory_space<vmem>>, vector<24x80xf32>
    tpu.vector_store %arg6[%c168_124, %c480_125], %136 {strides = array<i32>} : memref<216x640xf32, #tpu.memory_space<vmem>>, vector<24x80xf32>,
    %138 = vector.extract_strided_slice %121 {offsets = [0, 22], sizes = [24, 80], strides = [1, 1]} : vector<24x110xf32> to vector<24x80xf32>
    %c192_126 = arith.constant 192 : index
    %c480_127 = arith.constant 480 : index
    %139 = vector.load %arg6[%c192_126, %c480_127] : memref<216x640xf32, #tpu.memory_space<vmem>>, vector<24x80xf32>
    tpu.vector_store %arg6[%c192_126, %c480_127], %138 {strides = array<i32>} : memref<216x640xf32, #tpu.memory_space<vmem>>, vector<24x80xf32>,
    %c0_128 = arith.constant 0 : index
    %c56 = arith.constant 56 : index
    %c0_129 = arith.constant 0 : index
    %140 = vector.load %arg1[%c0_128, %c56, %c0_129] : memref<1x80x110xf32, #tpu.memory_space<vmem>>, vector<1x24x110xf32>
    %141 = vector.shape_cast %140 : vector<1x24x110xf32> to vector<24x110xf32>
    %142 = vector.extract_strided_slice %141 {offsets = [0, 0], sizes = [24, 80], strides = [1, 1]} : vector<24x110xf32> to vector<24x80xf32>
    %c0_130 = arith.constant 0 : index
    %c560 = arith.constant 560 : index
    %143 = vector.load %arg6[%c0_130, %c560] : memref<216x640xf32, #tpu.memory_space<vmem>>, vector<24x80xf32>
    tpu.vector_store %arg6[%c0_130, %c560], %142 {strides = array<i32>} : memref<216x640xf32, #tpu.memory_space<vmem>>, vector<24x80xf32>,
    %144 = vector.extract_strided_slice %141 {offsets = [0, 1], sizes = [24, 80], strides = [1, 1]} : vector<24x110xf32> to vector<24x80xf32>
    %c24_131 = arith.constant 24 : index
    %c560_132 = arith.constant 560 : index
    %145 = vector.load %arg6[%c24_131, %c560_132] : memref<216x640xf32, #tpu.memory_space<vmem>>, vector<24x80xf32>
    tpu.vector_store %arg6[%c24_131, %c560_132], %144 {strides = array<i32>} : memref<216x640xf32, #tpu.memory_space<vmem>>, vector<24x80xf32>,
    %146 = vector.extract_strided_slice %141 {offsets = [0, 2], sizes = [24, 80], strides = [1, 1]} : vector<24x110xf32> to vector<24x80xf32>
    %c48_133 = arith.constant 48 : index
    %c560_134 = arith.constant 560 : index
    %147 = vector.load %arg6[%c48_133, %c560_134] : memref<216x640xf32, #tpu.memory_space<vmem>>, vector<24x80xf32>
    tpu.vector_store %arg6[%c48_133, %c560_134], %146 {strides = array<i32>} : memref<216x640xf32, #tpu.memory_space<vmem>>, vector<24x80xf32>,
    %148 = vector.extract_strided_slice %141 {offsets = [0, 10], sizes = [24, 80], strides = [1, 1]} : vector<24x110xf32> to vector<24x80xf32>
    %c72_135 = arith.constant 72 : index
    %c560_136 = arith.constant 560 : index
    %149 = vector.load %arg6[%c72_135, %c560_136] : memref<216x640xf32, #tpu.memory_space<vmem>>, vector<24x80xf32>
    tpu.vector_store %arg6[%c72_135, %c560_136], %148 {strides = array<i32>} : memref<216x640xf32, #tpu.memory_space<vmem>>, vector<24x80xf32>,
    %150 = vector.extract_strided_slice %141 {offsets = [0, 11], sizes = [24, 80], strides = [1, 1]} : vector<24x110xf32> to vector<24x80xf32>
    %c96_137 = arith.constant 96 : index
    %c560_138 = arith.constant 560 : index
    %151 = vector.load %arg6[%c96_137, %c560_138] : memref<216x640xf32, #tpu.memory_space<vmem>>, vector<24x80xf32>
    tpu.vector_store %arg6[%c96_137, %c560_138], %150 {strides = array<i32>} : memref<216x640xf32, #tpu.memory_space<vmem>>, vector<24x80xf32>,
    %152 = vector.extract_strided_slice %141 {offsets = [0, 12], sizes = [24, 80], strides = [1, 1]} : vector<24x110xf32> to vector<24x80xf32>
    %c120_139 = arith.constant 120 : index
    %c560_140 = arith.constant 560 : index
    %153 = vector.load %arg6[%c120_139, %c560_140] : memref<216x640xf32, #tpu.memory_space<vmem>>, vector<24x80xf32>
    tpu.vector_store %arg6[%c120_139, %c560_140], %152 {strides = array<i32>} : memref<216x640xf32, #tpu.memory_space<vmem>>, vector<24x80xf32>,
    %154 = vector.extract_strided_slice %141 {offsets = [0, 20], sizes = [24, 80], strides = [1, 1]} : vector<24x110xf32> to vector<24x80xf32>
    %c144_141 = arith.constant 144 : index
    %c560_142 = arith.constant 560 : index
    %155 = vector.load %arg6[%c144_141, %c560_142] : memref<216x640xf32, #tpu.memory_space<vmem>>, vector<24x80xf32>
    tpu.vector_store %arg6[%c144_141, %c560_142], %154 {strides = array<i32>} : memref<216x640xf32, #tpu.memory_space<vmem>>, vector<24x80xf32>,
    %156 = vector.extract_strided_slice %141 {offsets = [0, 21], sizes = [24, 80], strides = [1, 1]} : vector<24x110xf32> to vector<24x80xf32>
    %c168_143 = arith.constant 168 : index
    %c560_144 = arith.constant 560 : index
    %157 = vector.load %arg6[%c168_143, %c560_144] : memref<216x640xf32, #tpu.memory_space<vmem>>, vector<24x80xf32>
    tpu.vector_store %arg6[%c168_143, %c560_144], %156 {strides = array<i32>} : memref<216x640xf32, #tpu.memory_space<vmem>>, vector<24x80xf32>,
    %158 = vector.extract_strided_slice %141 {offsets = [0, 22], sizes = [24, 80], strides = [1, 1]} : vector<24x110xf32> to vector<24x80xf32>
    %c192_145 = arith.constant 192 : index
    %c560_146 = arith.constant 560 : index
    %159 = vector.load %arg6[%c192_145, %c560_146] : memref<216x640xf32, #tpu.memory_space<vmem>>, vector<24x80xf32>
    tpu.vector_store %arg6[%c192_145, %c560_146], %158 {strides = array<i32>} : memref<216x640xf32, #tpu.memory_space<vmem>>, vector<24x80xf32>,
    %c0_147 = arith.constant 0 : index
    %c0_148 = arith.constant 0 : index
    %160 = vector.load %arg2[%c0_147, %c0_148] : memref<16x216xf32, #tpu.memory_space<vmem>>, vector<16x216xf32>
    %c0_149 = arith.constant 0 : index
    %c0_150 = arith.constant 0 : index
    %161 = vector.load %arg6[%c0_149, %c0_150] : memref<216x640xf32, #tpu.memory_space<vmem>>, vector<216x640xf32>
    %cst = arith.constant dense<0.000000e+00> : vector<16x640xf32>
    %162 = tpu.matmul %160, %161, %cst {dimension_numbers = #tpu.dot_dimension_numbers<[1], [0], [0], [1], [0, 0, 1, 1], [], []>} : vector<16x216xf32>, vector<216x640xf32>, vector<16x640xf32> -> vector<16x640xf32>
    %c0_151 = arith.constant 0 : index
    %c0_152 = arith.constant 0 : index
    %163 = vector.load %arg3[%c0_151, %c0_152] : memref<16x1xf32, #tpu.memory_space<vmem>>, vector<16x1xf32>
    %164 = vector.broadcast %163 : vector<16x1xf32> to vector<16x640xf32>
    %165 = arith.addf %162, %164 : vector<16x640xf32>
    %c0_153 = arith.constant 0 : index
    %c0_154 = arith.constant 0 : index
    %c0_155 = arith.constant 0 : index
    %166 = vector.load %arg4[%c0_153, %c0_154, %c0_155] : memref<1x16x1xf32, #tpu.memory_space<vmem>>, vector<1x16x1xf32>
    %167 = vector.shape_cast %166 : vector<1x16x1xf32> to vector<16x1xf32>
    %168 = vector.broadcast %167 : vector<16x1xf32> to vector<16x640xf32>
    %169 = arith.mulf %165, %168 : vector<16x640xf32>
    %c0_156 = arith.constant 0 : index
    %c0_157 = arith.constant 0 : index
    %c0_158 = arith.constant 0 : index
    %170 = vector.load %arg5[%c0_156, %c0_157, %c0_158] : memref<1x16x640xf32, #tpu.memory_space<vmem>>, vector<1x16x640xf32>
    %171 = vector.shape_cast %170 : vector<1x16x640xf32> to vector<16x640xf32>
    %172 = vector.shape_cast %169 : vector<16x640xf32> to vector<1x16x640xf32>
    tpu.vector_store %arg5[%c0_156, %c0_157, %c0_158], %172 {strides = array<i32>} : memref<1x16x640xf32, #tpu.memory_space<vmem>>, vector<1x16x640xf32>,
    return
  }
  func.func @transform_0(%arg0: i32) -> (i32, i32, i32) {
    %c0_i32 = arith.constant 0 : i32
    %c0_i32_0 = arith.constant 0 : i32
    %c0_i32_1 = arith.constant 0 : i32
    return %arg0, %c0_i32, %c0_i32_0 : i32, i32, i32
  }
  func.func @transform_1(%arg0: i32) -> (i32, i32) {
    %c0_i32 = arith.constant 0 : i32
    %c0_i32_0 = arith.constant 0 : i32
    %c0_i32_1 = arith.constant 0 : i32
    return %c0_i32, %c0_i32_0 : i32, i32
  }
  func.func @transform_2(%arg0: i32) -> (i32, i32) {
    %c0_i32 = arith.constant 0 : i32
    %c0_i32_0 = arith.constant 0 : i32
    %c0_i32_1 = arith.constant 0 : i32
    return %c0_i32, %c0_i32_0 : i32, i32
  }
  func.func @transform_3(%arg0: i32) -> (i32, i32, i32) {
    %c0_i32 = arith.constant 0 : i32
    %c0_i32_0 = arith.constant 0 : i32
    %c0_i32_1 = arith.constant 0 : i32
    return %arg0, %c0_i32, %c0_i32_0 : i32, i32, i32
  }
  func.func @transform_4(%arg0: i32) -> (i32, i32, i32) {
    %c0_i32 = arith.constant 0 : i32
    %c0_i32_0 = arith.constant 0 : i32
    %c0_i32_1 = arith.constant 0 : i32
    return %arg0, %c0_i32, %c0_i32_0 : i32, i32, i32
  }
}

</mosaic_0001>

<bundles_post_ra>
// kernel: init_conv_forward.1
= control target key start
LH: loop header
LB: loop body
LE: loop exit
PB: predicated region body
PF: predicated region fallthrough
CT: control target
= control target key end

     0   :  { %s2114_s15 = smov 0   ;;  %s2930_s0 = inlined_call_operand.vmem [shape: f32[2,80,110], index: 0, kind: input, shape index: {}]   ;;  %s2931_s1 = inlined_call_operand.vmem [shape: f32[16,216], index: 1, kind: input, shape index: {}]   ;;  %s2932_s2 = inlined_call_operand.vmem [shape: f32[16,1], index: 2, kind: input, shape index: {}]   ;;  %s2933_s3 = inlined_call_operand.vmem [shape: f32[2,16,1], index: 3, kind: input, shape index: {}]   ;;  %s2934_s4 = inlined_call_operand.vmem [shape: f32[2,16,640], index: 4, kind: output, shape index: {}]  }
   0x1 LB: > { %s1727_s16 = sadd.s32 4294967295, %s2013_s15   ;;  %p1731_p0 = scmp.ge.s32.totalorder %s2013_s15, 1  ;;  %s2013_s15 = sphi %s2114_s15, %s14_s15  }
   0x2   : > { %p172_p1 = scmp.lt.s32.totalorder %s2013_s15, 3 }
   0x4   : > { %p173_p2 = pnand %p1731_p0, %p172_p1 }
   0x5   : > { %p203_p3 = scmp.lt.s32.totalorder (!%p173_p2), %s1727_s16, 1  ;;  %vm221_vm0 = vcmask (!%p173_p2), 654336   ;;  %s2015_s21 = smov (!%p173_p2), 127   ;;  %vm339_vm1 = vcmask (!%p173_p2), 1048192   ;;  %vm341_vm2 = vcmask (!%p173_p2), 261120   ;;  %vm742_vm3 = vcmask (!%p173_p2), 130048  }
   0x6   : > { %176 = sbr.rel (%p173_p2) target bundleno = 787 (0x313), region = 36  ;;  %s2016_s22 = smov (!%p173_p2), 126   ;;  %vm482_vm4 = vcmask (!%p173_p2), 916736   ;;  %vm883_vm5 = vcmask (!%p173_p2), 785536   ;;  %vm597_vm6 = vcmask (!%p173_p2), 1048448   ;;  %vm599_vm7 = vcmask (!%p173_p2), 523264  }
   0x7   : > { %s2017_s23 = smov (!%p173_p2), 118   ;;  %s2018_s24 = smov (!%p173_p2), 117   ;;  %vm740_vm8 = vcmask (!%p173_p2), 1048064   ;;  %vm998_vm9 = vcmask (!%p173_p2), 1048320   ;;  %vm1000_vm10 = vcmask (!%p173_p2), 392192   ;;  %vm1392_vm11 = vcmask (!%p173_p2), 719872  }
   0x8   : > { %s2019_s25 = smov (!%p173_p2), 116   ;;  %s2020_s26 = smov (!%p173_p2), 108   ;;  %vm1141_vm12 = vcmask (!%p173_p2), 1047936  }
   0x9   : > { %s2021_s27 = smov (!%p173_p2), 107   ;;  %s2022_s28 = smov (!%p173_p2), 106  }
   0xa   : > { %s2023_s29 = smov (!%p173_p2), 80   ;;  %s2024_s30 = smov (!%p173_p2), 64  }
   0xb   : > { %s2025_s5 = smov (!%p173_p2), 32   ;;  %s2026_s6 = smov (!%p173_p2), 16  }
   0xc   : > { %s2027_s7 = smov (!%p173_p2), 112   ;;  %s2028_s8 = smov (!%p173_p2), 96  }
   0xd   : > { %s2936_s16 = smov (!%p203_p3, %s1727_s16), 1  ;;  %s2029_s9 = smov 79  }
   0xe   : > { %s1916_s17 = smul.u32 80, %s2936_s16  ;;  %s2030_s10 = smov 63  }
   0xf   : > { %s2031_s11 = smov 31   ;;  %s2032_s12 = smov 15  }
  0x10   : > { %s2130_s20 = scalar_lea.vmem %s2930_s0, %s1916_s17  ;;  %s2033_s13 = smov 111  }
  0x11   : > { %v2133_v0 = vld [vmem:[%s2130_s20 + $0x10] sm:$0xff]  ;;  %v218_v1 = vld [vmem:[%s2130_s20] sm:$0xff]  ;;  %v2137_v2 = vld [vmem:[%s2130_s20 + $0x8] sm:$0xff]  ;;  %s2034_s14 = smov 95   ;;  %s2035_s18 = smov 78  }
  0x12   : > { %232 = vrot.lane.b32.xlu1 %v2133_v0, %s2015_s21  ;;  %228 = vrot.lane.b32.xlu0 %v218_v1, %s2015_s21  ;;  %222 = vst.msk [vmem:[#allocation2] sm:$0xff] %vm221_vm0, %v218_v1  ;;  %223 = vst.msk [vmem:[#allocation2 + $0x28] sm:$0xff] %vm221_vm0, %v2137_v2  ;;  %v2163_v3 = vld [vmem:[%s2130_s20 + $0x28] sm:$0xff]  ;;  %v2166_v4 = vld [vmem:[%s2130_s20 + $0x20] sm:$0xff]  ;;  %s2036_s19 = smov 62  }
  0x13   : > { %224 = vst.msk [vmem:[#allocation2 + $0x50] sm:$0xff] %vm221_vm0, %v2133_v0  ;;  %v2171_v5 = vld [vmem:[%s2130_s20 + $0x18] sm:$0xff]  ;;  %v2176_v6 = vld [vmem:[%s2130_s20 + $0x30] sm:$0xff]  ;;  %v2198_v8 = vld [vmem:[%s2130_s20 + $0x40] sm:$0xff] }
  0x14   : > { %v2183_v7 = vld [vmem:[%s2130_s20 + $0x38] sm:$0xff] }
  0x16   : > { %240 = vrot.lane.b32.xlu1 %v218_v1, %s2016_s22  ;;  %230 = vrot.lane.b32.xlu0 %v2137_v2, %s2015_s21  ;;  %s2037_s21 = smov 30  }
  0x1a   : > { %244 = vrot.lane.b32.xlu1 %v2133_v0, %s2016_s22  ;;  %242 = vrot.lane.b32.xlu0 %v2137_v2, %s2016_s22  ;;  %s2038_s22 = smov 14  }
  0x1e   : > { %254 = vrot.lane.b32.xlu1 %v2137_v2, %s2017_s23  ;;  %252 = vrot.lane.b32.xlu0 %v218_v1, %s2017_s23 }
  0x22   : > { %264 = vrot.lane.b32.xlu1 %v218_v1, %s2018_s24  ;;  %256 = vrot.lane.b32.xlu0 %v2133_v0, %s2017_s23  ;;  %s2039_s23 = smov 110  }
  0x26   : > { %268 = vrot.lane.b32.xlu1 %v2133_v0, %s2018_s24  ;;  %266 = vrot.lane.b32.xlu0 %v2137_v2, %s2018_s24  ;;  %s2040_s24 = smov 94  }
  0x2a   : > { %278 = vrot.lane.b32.xlu1 %v2137_v2, %s2019_s25  ;;  %276 = vrot.lane.b32.xlu0 %v218_v1, %s2019_s25 }
  0x2e   : > { %288 = vrot.lane.b32.xlu1 %v218_v1, %s2020_s26  ;;  %280 = vrot.lane.b32.xlu0 %v2133_v0, %s2019_s25  ;;  %s2041_s25 = smov 70  }
  0x32   : > { %292 = vrot.lane.b32.xlu1 %v2133_v0, %s2020_s26  ;;  %290 = vrot.lane.b32.xlu0 %v2137_v2, %s2020_s26  ;;  %s2042_s26 = smov 54  }
  0x36   : > { %302 = vrot.lane.b32.xlu1 %v2137_v2, %s2021_s27  ;;  %300 = vrot.lane.b32.xlu0 %v218_v1, %s2021_s27 }
  0x3a   : > { %312 = vrot.lane.b32.xlu1 %v218_v1, %s2022_s28  ;;  %304 = vrot.lane.b32.xlu0 %v2133_v0, %s2021_s27  ;;  %s2043_s27 = smov 22  }
  0x3e   : > { %316 = vrot.lane.b32.xlu1 %v2133_v0, %s2022_s28  ;;  %314 = vrot.lane.b32.xlu0 %v2137_v2, %s2022_s28  ;;  %s2044_s28 = smov 6  }
  0x42   : > { %332 = vrot.lane.b32.xlu1 %v2133_v0, %s2023_s29  ;;  %330 = vrot.lane.b32.xlu0 %v2137_v2, %s2023_s29 }
  0x46   : > { %733 = vrot.lane.b32.xlu1 %v2163_v3, %s2024_s30  ;;  %731 = vrot.lane.b32.xlu0 %v2166_v4, %s2024_s30 }
  0x4a   : > { %475 = vrot.lane.b32.xlu1 %v2171_v5, %s2025_s5  ;;  %473 = vrot.lane.b32.xlu0 %v2133_v0, %s2025_s5 }
  0x4e   : > { %876 = vrot.lane.b32.xlu1 %v2176_v6, %s2026_s6  ;;  %874 = vrot.lane.b32.xlu0 %v2163_v3, %s2026_s6 }
  0x52   : > { %590 = vrot.lane.b32.xlu1 %v2166_v4, %s2027_s7  ;;  %588 = vrot.lane.b32.xlu0 %v2171_v5, %s2027_s7 }
  0x56   : > { %991 = vrot.lane.b32.xlu1 %v2183_v7, %s2028_s8  ;;  %989 = vrot.lane.b32.xlu0 %v2176_v6, %s2028_s8 }
  0x5a   : > { %347 = vrot.lane.b32.xlu1 %v2137_v2, %s2029_s9  ;;  %334 = vrot.lane.b32.xlu0 %v2171_v5, %s2023_s29  ;;  %s2045_s29 = smov 102  }
  0x5e   : > { %748 = vrot.lane.b32.xlu1 %v2166_v4, %s2030_s10  ;;  %735 = vrot.lane.b32.xlu0 %v2176_v6, %s2024_s30  ;;  %s2046_s30 = smov 86  }
  0x62   : > { %486 = vrot.lane.b32.xlu1 %v2133_v0, %s2031_s11  ;;  %477 = vrot.lane.b32.xlu0 %v2166_v4, %s2025_s5  ;;  %s2047_s5 = smov 69  }
  0x66   : > { %887 = vrot.lane.b32.xlu1 %v2163_v3, %s2032_s12  ;;  %878 = vrot.lane.b32.xlu0 %v2183_v7, %s2026_s6  ;;  %s2048_s6 = smov 53  }
  0x6a   : > { %605 = vrot.lane.b32.xlu1 %v2171_v5, %s2033_s13  ;;  %592 = vrot.lane.b32.xlu0 %v2163_v3, %s2027_s7  ;;  %s2049_s7 = smov 21  }
  0x6e   : > { %1006 = vrot.lane.b32.xlu1 %v2176_v6, %s2034_s14  ;;  %993 = vrot.lane.b32.xlu0 %v2198_v8, %s2028_s8  ;;  %s2050_s8 = smov 5  }
  0x72   : > { %351 = vrot.lane.b32.xlu1 %v2171_v5, %s2029_s9  ;;  %349 = vrot.lane.b32.xlu0 %v2133_v0, %s2029_s9  ;;  %s2051_s9 = smov 101  }
  0x76   : > { %752 = vrot.lane.b32.xlu1 %v2176_v6, %s2030_s10  ;;  %750 = vrot.lane.b32.xlu0 %v2163_v3, %s2030_s10  ;;  %s2052_s10 = smov 85  }
  0x7a   : > { %490 = vrot.lane.b32.xlu1 %v2166_v4, %s2031_s11  ;;  %488 = vrot.lane.b32.xlu0 %v2171_v5, %s2031_s11  ;;  %s2053_s11 = smov 68  }
  0x7e   : > { %891 = vrot.lane.b32.xlu1 %v2183_v7, %s2032_s12  ;;  %889 = vrot.lane.b32.xlu0 %v2176_v6, %s2032_s12  ;;  %s2054_s12 = smov 52  }
  0x82   : > { %609 = vrot.lane.b32.xlu1 %v2163_v3, %s2033_s13  ;;  %607 = vrot.lane.b32.xlu0 %v2166_v4, %s2033_s13  ;;  %s2055_s13 = smov 20  }
  0x84   : > { %v233_v9 = vpop.permute.xlu1 %232  ;;  %v229_v10 = vpop.permute.xlu0 %228 }
  0x85   : > { %239 = vst.msk [vmem:[#allocation2 + $0xc8] sm:$0xff] %vm221_vm0, %v233_v9  ;;  %237 = vst.msk [vmem:[#allocation2 + $0x78] sm:$0xff] %vm221_vm0, %v229_v10 }
  0x86   : > { %1010 = vrot.lane.b32.xlu1 %v2198_v8, %s2034_s14  ;;  %1008 = vrot.lane.b32.xlu0 %v2183_v7, %s2034_s14  ;;  %s2056_s14 = smov 4  }
  0x88   : > { %v241_v11 = vpop.permute.xlu1 %240  ;;  %v231_v12 = vpop.permute.xlu0 %230 }
  0x89   : > { %249 = vst.msk [vmem:[#allocation2 + $0xf0] sm:$0xff] %vm221_vm0, %v241_v11  ;;  %238 = vst.msk [vmem:[#allocation2 + $0xa0] sm:$0xff] %vm221_vm0, %v231_v12 }
  0x8a   : > { %364 = vrot.lane.b32.xlu1 %v2133_v0, %s2035_s18  ;;  %362 = vrot.lane.b32.xlu0 %v2137_v2, %s2035_s18 }
  0x8c   : > { %v245_v13 = vpop.permute.xlu1 %244  ;;  %v243_v14 = vpop.permute.xlu0 %242 }
  0x8d   : > { %251 = vst.msk [vmem:[#allocation2 + $0x140] sm:$0xff] %vm221_vm0, %v245_v13  ;;  %250 = vst.msk [vmem:[#allocation2 + $0x118] sm:$0xff] %vm221_vm0, %v243_v14 }
  0x8e   : > { %765 = vrot.lane.b32.xlu1 %v2163_v3, %s2036_s19  ;;  %763 = vrot.lane.b32.xlu0 %v2166_v4, %s2036_s19 }
  0x90   : > { %v255_v15 = vpop.permute.xlu1 %254  ;;  %v253_v16 = vpop.permute.xlu0 %252 }
  0x91   : > { %262 = vst.msk [vmem:[#allocation2 + $0x190] sm:$0xff] %vm221_vm0, %v255_v15  ;;  %261 = vst.msk [vmem:[#allocation2 + $0x168] sm:$0xff] %vm221_vm0, %v253_v16 }
  0x92   : > { %500 = vrot.lane.b32.xlu1 %v2171_v5, %s2037_s21  ;;  %498 = vrot.lane.b32.xlu0 %v2133_v0, %s2037_s21 }
  0x94   : > { %v265_v17 = vpop.permute.xlu1 %264  ;;  %v257_v18 = vpop.permute.xlu0 %256 }
  0x95   : > { %273 = vst.msk [vmem:[#allocation2 + $0x1e0] sm:$0xff] %vm221_vm0, %v265_v17  ;;  %263 = vst.msk [vmem:[#allocation2 + $0x1b8] sm:$0xff] %vm221_vm0, %v257_v18 }
  0x96   : > { %901 = vrot.lane.b32.xlu1 %v2176_v6, %s2038_s22  ;;  %899 = vrot.lane.b32.xlu0 %v2163_v3, %s2038_s22 }
  0x98   : > { %v269_v19 = vpop.permute.xlu1 %268  ;;  %v267_v20 = vpop.permute.xlu0 %266 }
  0x99   : > { %275 = vst.msk [vmem:[#allocation2 + $0x230] sm:$0xff] %vm221_vm0, %v269_v19  ;;  %274 = vst.msk [vmem:[#allocation2 + $0x208] sm:$0xff] %vm221_vm0, %v267_v20 }
  0x9a   : > { %622 = vrot.lane.b32.xlu1 %v2166_v4, %s2039_s23  ;;  %620 = vrot.lane.b32.xlu0 %v2171_v5, %s2039_s23 }
  0x9c   : > { %v279_v21 = vpop.permute.xlu1 %278  ;;  %v277_v22 = vpop.permute.xlu0 %276 }
  0x9d   : > { %286 = vst.msk [vmem:[#allocation2 + $0x280] sm:$0xff] %vm221_vm0, %v279_v21  ;;  %285 = vst.msk [vmem:[#allocation2 + $0x258] sm:$0xff] %vm221_vm0, %v277_v22 }
  0x9e   : > { %1023 = vrot.lane.b32.xlu1 %v2183_v7, %s2040_s24  ;;  %1021 = vrot.lane.b32.xlu0 %v2176_v6, %s2040_s24 }
  0xa0   : > { %v289_v23 = vpop.permute.xlu1 %288  ;;  %v281_v24 = vpop.permute.xlu0 %280 }
  0xa1   : > { %297 = vst.msk [vmem:[#allocation2 + $0x2d0] sm:$0xff] %vm221_vm0, %v289_v23  ;;  %287 = vst.msk [vmem:[#allocation2 + $0x2a8] sm:$0xff] %vm221_vm0, %v281_v24 }
  0xa2   : > { %377 = vrot.lane.b32.xlu1 %v2137_v2, %s2041_s25  ;;  %366 = vrot.lane.b32.xlu0 %v2171_v5, %s2035_s18  ;;  %s2057_s18 = smov 100  }
  0xa4   : > { %v293_v25 = vpop.permute.xlu1 %292  ;;  %v291_v26 = vpop.permute.xlu0 %290 }
  0xa5   : > { %299 = vst.msk [vmem:[#allocation2 + $0x320] sm:$0xff] %vm221_vm0, %v293_v25  ;;  %298 = vst.msk [vmem:[#allocation2 + $0x2f8] sm:$0xff] %vm221_vm0, %v291_v26 }
  0xa6   : > { %778 = vrot.lane.b32.xlu1 %v2166_v4, %s2042_s26  ;;  %767 = vrot.lane.b32.xlu0 %v2176_v6, %s2036_s19  ;;  %s2058_s19 = smov 84  }
  0xa8   : > { %v303_v27 = vpop.permute.xlu1 %302  ;;  %v301_v28 = vpop.permute.xlu0 %300 }
  0xa9   : > { %310 = vst.msk [vmem:[#allocation2 + $0x370] sm:$0xff] %vm221_vm0, %v303_v27  ;;  %309 = vst.msk [vmem:[#allocation2 + $0x348] sm:$0xff] %vm221_vm0, %v301_v28 }
  0xaa   : > { %510 = vrot.lane.b32.xlu1 %v2133_v0, %s2043_s27  ;;  %502 = vrot.lane.b32.xlu0 %v2166_v4, %s2037_s21  ;;  %s2059_s21 = smov 60  }
  0xac   : > { %v313_v29 = vpop.permute.xlu1 %312  ;;  %v305_v30 = vpop.permute.xlu0 %304 }
  0xad   : > { %321 = vst.msk [vmem:[#allocation2 + $0x3c0] sm:$0xff] %vm221_vm0, %v313_v29  ;;  %311 = vst.msk [vmem:[#allocation2 + $0x398] sm:$0xff] %vm221_vm0, %v305_v30 }
  0xae   : > { %911 = vrot.lane.b32.xlu1 %v2163_v3, %s2044_s28  ;;  %903 = vrot.lane.b32.xlu0 %v2183_v7, %s2038_s22  ;;  %s2060_s22 = smov 44  }
  0xb0   : > { %v317_v31 = vpop.permute.xlu1 %316  ;;  %v315_v32 = vpop.permute.xlu0 %314 }
  0xb1   : > { %323 = vst.msk [vmem:[#allocation2 + $0x410] sm:$0xff] %vm221_vm0, %v317_v31  ;;  %322 = vst.msk [vmem:[#allocation2 + $0x3e8] sm:$0xff] %vm221_vm0, %v315_v32 }
  0xb2   : > { %635 = vrot.lane.b32.xlu1 %v2171_v5, %s2045_s29  ;;  %624 = vrot.lane.b32.xlu0 %v2163_v3, %s2039_s23  ;;  %s2061_s23 = smov 12  }
  0xb4   : > { %v333_v33 = vpop.permute.xlu1 %332  ;;  %v331_v34 = vpop.permute.xlu0 %330 }
  0xb5   : > { %343 = vst.msk [vmem:[#allocation2 + $0x28] sm:$0xff] %vm339_vm1, %v333_v33  ;;  %340 = vst.msk [vmem:[#allocation2] sm:$0xff] %vm339_vm1, %v331_v34 }
  0xb6   : > { %344 = vst.msk [vmem:[#allocation2 + $0x30] sm:$0xff] %vm341_vm2, %v333_v33  ;;  %342 = vst.msk [vmem:[#allocation2 + $0x8] sm:$0xff] %vm341_vm2, %v331_v34  ;;  %1036 = vrot.lane.b32.xlu1 %v2176_v6, %s2046_s30  ;;  %1025 = vrot.lane.b32.xlu0 %v2198_v8, %s2040_s24  ;;  %s2062_s24 = smov 124  }
  0xb8   : > { %v734_v35 = vpop.permute.xlu1 %733  ;;  %v732_v36 = vpop.permute.xlu0 %731 }
  0xb9   : > { %745 = vst.msk [vmem:[#allocation2 + $0x40] sm:$0xff] %vm742_vm3, %v734_v35  ;;  %743 = vst.msk [vmem:[#allocation2 + $0x18] sm:$0xff] %vm742_vm3, %v732_v36 }
  0xba   : > { %381 = vrot.lane.b32.xlu1 %v2171_v5, %s2041_s25  ;;  %379 = vrot.lane.b32.xlu0 %v2133_v0, %s2041_s25  ;;  %s2063_s25 = smov 92  }
  0xbc   : > { %v476_v37 = vpop.permute.xlu1 %475  ;;  %v474_v38 = vpop.permute.xlu0 %473  ;;  %v1245_v45 = vld [vmem:[#allocation2] sm:$0xff]  ;;  %v1250_v46 = vld [vmem:[#allocation2 + $0x28] sm:$0xff] }
  0xbd   : > { %484 = vst.msk [vmem:[#allocation2 + $0x30] sm:$0xff] %vm482_vm4, %v476_v37  ;;  %483 = vst.msk [vmem:[#allocation2 + $0x8] sm:$0xff] %vm482_vm4, %v474_v38  ;;  %v1747_v52 = vpack.c.bf16 %v1250_v46, %v1245_v45 }
  0xbe   : > { %782 = vrot.lane.b32.xlu1 %v2176_v6, %s2042_s26  ;;  %780 = vrot.lane.b32.xlu0 %v2163_v3, %s2042_s26  ;;  %s2064_s26 = smov 76  }
  0xc0   : > { %v877_v39 = vpop.permute.xlu1 %876  ;;  %v875_v40 = vpop.permute.xlu0 %874 }
  0xc1   : > { %885 = vst.msk [vmem:[#allocation2 + $0x40] sm:$0xff] %vm883_vm5, %v877_v39  ;;  %884 = vst.msk [vmem:[#allocation2 + $0x18] sm:$0xff] %vm883_vm5, %v875_v40 }
  0xc2   : > { %514 = vrot.lane.b32.xlu1 %v2166_v4, %s2043_s27  ;;  %512 = vrot.lane.b32.xlu0 %v2171_v5, %s2043_s27  ;;  %s2065_s27 = smov 59  }
  0xc4   : > { %v591_v41 = vpop.permute.xlu1 %590  ;;  %v589_v42 = vpop.permute.xlu0 %588 }
  0xc5   : > { %601 = vst.msk [vmem:[#allocation2 + $0x30] sm:$0xff] %vm597_vm6, %v591_v41  ;;  %598 = vst.msk [vmem:[#allocation2 + $0x8] sm:$0xff] %vm597_vm6, %v589_v42 }
  0xc6   : > { %602 = vst.msk [vmem:[#allocation2 + $0x38] sm:$0xff] %vm599_vm7, %v591_v41  ;;  %600 = vst.msk [vmem:[#allocation2 + $0x10] sm:$0xff] %vm599_vm7, %v589_v42  ;;  %915 = vrot.lane.b32.xlu1 %v2183_v7, %s2044_s28  ;;  %913 = vrot.lane.b32.xlu0 %v2176_v6, %s2044_s28  ;;  %s2066_s28 = smov 43  }
  0xc7   : > { %744 = vst.msk [vmem:[#allocation2 + $0x38] sm:$0xff] %vm740_vm8, %v734_v35  ;;  %741 = vst.msk [vmem:[#allocation2 + $0x10] sm:$0xff] %vm740_vm8, %v732_v36 }
  0xc8   : > { %v992_v43 = vpop.permute.xlu1 %991  ;;  %v990_v44 = vpop.permute.xlu0 %989 }
  0xc9   : > { %1002 = vst.msk [vmem:[#allocation2 + $0x40] sm:$0xff] %vm998_vm9, %v992_v43  ;;  %999 = vst.msk [vmem:[#allocation2 + $0x18] sm:$0xff] %vm998_vm9, %v990_v44 }
  0xca   : > { %1003 = vst.msk [vmem:[#allocation2 + $0x48] sm:$0xff] %vm1000_vm10, %v992_v43  ;;  %1001 = vst.msk [vmem:[#allocation2 + $0x20] sm:$0xff] %vm1000_vm10, %v990_v44  ;;  %639 = vrot.lane.b32.xlu1 %v2163_v3, %s2045_s29  ;;  %637 = vrot.lane.b32.xlu0 %v2166_v4, %s2045_s29  ;;  %s2067_s29 = smov 11  }
  0xcc   : > { %v348_v47 = vpop.permute.xlu1 %347  ;;  %v335_v48 = vpop.permute.xlu0 %334  ;;  %v1246_v49 = vld [vmem:[#allocation2 + $0x8] sm:$0xff]  ;;  %v1251_v50 = vld [vmem:[#allocation2 + $0x30] sm:$0xff] }
  0xcd   : > { %356 = vst.msk [vmem:[#allocation2 + $0x78] sm:$0xff] %vm339_vm1, %v348_v47  ;;  %345 = vst.msk [vmem:[#allocation2 + $0x50] sm:$0xff] %vm339_vm1, %v335_v48  ;;  %v1745_v51 = vpack.c.bf16 %v1251_v50, %v1246_v49 }
  0xce   : > { %357 = vst.msk [vmem:[#allocation2 + $0x80] sm:$0xff] %vm341_vm2, %v348_v47  ;;  %346 = vst.msk [vmem:[#allocation2 + $0x58] sm:$0xff] %vm341_vm2, %v335_v48  ;;  %1040 = vrot.lane.b32.xlu1 %v2198_v8, %s2046_s30  ;;  %1038 = vrot.lane.b32.xlu0 %v2183_v7, %s2046_s30  ;;  %v1247_v53 = vld [vmem:[#allocation2 + $0x10] sm:$0xff]  ;;  %v1252_v54 = vld [vmem:[#allocation2 + $0x38] sm:$0xff]  ;;  %s2068_s30 = smov 123  }
  0xcf   : > { %1746 = vmatprep.subr.bf16.mxu0 %v1745_v51  ;;  %v1799_v60 = vpack.c.bf16 %v1252_v54, %v1247_v53 }
  0xd0   : > { %v749_v55 = vpop.permute.xlu1 %748  ;;  %v736_v56 = vpop.permute.xlu0 %735  ;;  %1748 = vmatpush1.bf16.msra.mxu0 %v1747_v52  ;;  %v1248_v57 = vld [vmem:[#allocation2 + $0x18] sm:$0xff]  ;;  %v1253_v58 = vld [vmem:[#allocation2 + $0x40] sm:$0xff] }
  0xd1   : > { %758 = vst.msk [vmem:[#allocation2 + $0x90] sm:$0xff] %vm742_vm3, %v749_v55  ;;  %747 = vst.msk [vmem:[#allocation2 + $0x68] sm:$0xff] %vm742_vm3, %v736_v56  ;;  %v1797_v59 = vpack.c.bf16 %v1253_v58, %v1248_v57 }
  0xd2   : > { %394 = vrot.lane.b32.xlu1 %v2133_v0, %s2047_s5  ;;  %392 = vrot.lane.b32.xlu0 %v2137_v2, %s2047_s5 }
  0xd3   : > { %1798 = vmatprep.subr.bf16.mxu1 %v1797_v59 }
  0xd4   : > { %v487_v61 = vpop.permute.xlu1 %486  ;;  %1800 = vmatpush1.bf16.msra.mxu1 %v1799_v60  ;;  %v478_v62 = vpop.permute.xlu0 %477  ;;  %v1255_v13 = vld [vmem:[#allocation2 + $0x50] sm:$0xff]  ;;  %v1260_v14 = vld [vmem:[#allocation2 + $0x78] sm:$0xff] }
  0xd5   : > { %495 = vst.msk [vmem:[#allocation2 + $0x80] sm:$0xff] %vm482_vm4, %v487_v61  ;;  %485 = vst.msk [vmem:[#allocation2 + $0x58] sm:$0xff] %vm482_vm4, %v478_v62  ;;  %v1751_v20 = vpack.c.bf16 %v1260_v14, %v1255_v13 }
  0xd6   : > { %795 = vrot.lane.b32.xlu1 %v2163_v3, %s2048_s6  ;;  %793 = vrot.lane.b32.xlu0 %v2166_v4, %s2048_s6 }
  0xd8   : > { %v888_v63 = vpop.permute.xlu1 %887  ;;  %v879_v1 = vpop.permute.xlu0 %878 }
  0xd9   : > { %896 = vst.msk [vmem:[#allocation2 + $0x90] sm:$0xff] %vm883_vm5, %v888_v63  ;;  %886 = vst.msk [vmem:[#allocation2 + $0x68] sm:$0xff] %vm883_vm5, %v879_v1 }
  0xda   : > { %524 = vrot.lane.b32.xlu1 %v2171_v5, %s2049_s7  ;;  %522 = vrot.lane.b32.xlu0 %v2133_v0, %s2049_s7 }
  0xdc   : > { %v606_v9 = vpop.permute.xlu1 %605  ;;  %v593_v10 = vpop.permute.xlu0 %592 }
  0xdd   : > { %614 = vst.msk [vmem:[#allocation2 + $0x80] sm:$0xff] %vm597_vm6, %v606_v9  ;;  %603 = vst.msk [vmem:[#allocation2 + $0x58] sm:$0xff] %vm597_vm6, %v593_v10 }
  0xde   : > { %615 = vst.msk [vmem:[#allocation2 + $0x88] sm:$0xff] %vm599_vm7, %v606_v9  ;;  %604 = vst.msk [vmem:[#allocation2 + $0x60] sm:$0xff] %vm599_vm7, %v593_v10  ;;  %925 = vrot.lane.b32.xlu1 %v2176_v6, %s2050_s8  ;;  %923 = vrot.lane.b32.xlu0 %v2163_v3, %s2050_s8 }
  0xdf   : > { %757 = vst.msk [vmem:[#allocation2 + $0x88] sm:$0xff] %vm740_vm8, %v749_v55  ;;  %746 = vst.msk [vmem:[#allocation2 + $0x60] sm:$0xff] %vm740_vm8, %v736_v56 }
  0xe0   : > { %v1007_v11 = vpop.permute.xlu1 %1006  ;;  %v994_v12 = vpop.permute.xlu0 %993 }
  0xe1   : > { %1015 = vst.msk [vmem:[#allocation2 + $0x90] sm:$0xff] %vm998_vm9, %v1007_v11  ;;  %1004 = vst.msk [vmem:[#allocation2 + $0x68] sm:$0xff] %vm998_vm9, %v994_v12 }
  0xe2   : > { %1016 = vst.msk [vmem:[#allocation2 + $0x98] sm:$0xff] %vm1000_vm10, %v1007_v11  ;;  %1005 = vst.msk [vmem:[#allocation2 + $0x70] sm:$0xff] %vm1000_vm10, %v994_v12  ;;  %652 = vrot.lane.b32.xlu1 %v2166_v4, %s2051_s9  ;;  %650 = vrot.lane.b32.xlu0 %v2171_v5, %s2051_s9 }
  0xe4   : > { %v352_v15 = vpop.permute.xlu1 %351  ;;  %v350_v16 = vpop.permute.xlu0 %349  ;;  %v1256_v17 = vld [vmem:[#allocation2 + $0x58] sm:$0xff]  ;;  %v1261_v18 = vld [vmem:[#allocation2 + $0x80] sm:$0xff] }
  0xe5   : > { %360 = vst.msk [vmem:[#allocation2 + $0xc8] sm:$0xff] %vm339_vm1, %v352_v15  ;;  %358 = vst.msk [vmem:[#allocation2 + $0xa0] sm:$0xff] %vm339_vm1, %v350_v16  ;;  %v1749_v19 = vpack.c.bf16 %v1261_v18, %v1256_v17 }
  0xe6   : > { %361 = vst.msk [vmem:[#allocation2 + $0xd0] sm:$0xff] %vm341_vm2, %v352_v15  ;;  %359 = vst.msk [vmem:[#allocation2 + $0xa8] sm:$0xff] %vm341_vm2, %v350_v16  ;;  %1053 = vrot.lane.b32.xlu1 %v2183_v7, %s2052_s10  ;;  %1051 = vrot.lane.b32.xlu0 %v2176_v6, %s2052_s10  ;;  %v1257_v21 = vld [vmem:[#allocation2 + $0x60] sm:$0xff]  ;;  %v1262_v22 = vld [vmem:[#allocation2 + $0x88] sm:$0xff] }
  0xe7   : > { %1750 = vmatprep.subr.bf16.mxu0 %v1749_v19  ;;  %v1803_v28 = vpack.c.bf16 %v1262_v22, %v1257_v21 }
  0xe8   : > { %v753_v23 = vpop.permute.xlu1 %752  ;;  %v751_v24 = vpop.permute.xlu0 %750  ;;  %1752 = vmatpush1.bf16.msra.mxu0 %v1751_v20  ;;  %v1258_v25 = vld [vmem:[#allocation2 + $0x68] sm:$0xff]  ;;  %v1263_v26 = vld [vmem:[#allocation2 + $0x90] sm:$0xff] }
  0xe9   : > { %762 = vst.msk [vmem:[#allocation2 + $0xe0] sm:$0xff] %vm742_vm3, %v753_v23  ;;  %760 = vst.msk [vmem:[#allocation2 + $0xb8] sm:$0xff] %vm742_vm3, %v751_v24  ;;  %v1801_v27 = vpack.c.bf16 %v1263_v26, %v1258_v25 }
  0xea   : > { %407 = vrot.lane.b32.xlu1 %v2137_v2, %s2053_s11  ;;  %396 = vrot.lane.b32.xlu0 %v2171_v5, %s2047_s5  ;;  %s2069_s5 = smov 91  }
  0xeb   : > { %1802 = vmatprep.subr.bf16.mxu1 %v1801_v27 }
  0xec   : > { %v491_v29 = vpop.permute.xlu1 %490  ;;  %1804 = vmatpush1.bf16.msra.mxu1 %v1803_v28  ;;  %v489_v30 = vpop.permute.xlu0 %488  ;;  %v1265_v37 = vld [vmem:[#allocation2 + $0xa0] sm:$0xff]  ;;  %v1270_v38 = vld [vmem:[#allocation2 + $0xc8] sm:$0xff] }
  0xed   : > { %497 = vst.msk [vmem:[#allocation2 + $0xd0] sm:$0xff] %vm482_vm4, %v491_v29  ;;  %496 = vst.msk [vmem:[#allocation2 + $0xa8] sm:$0xff] %vm482_vm4, %v489_v30  ;;  %v1755_v44 = vpack.c.bf16 %v1270_v38, %v1265_v37 }
  0xee   : > { %808 = vrot.lane.b32.xlu1 %v2166_v4, %s2054_s12  ;;  %797 = vrot.lane.b32.xlu0 %v2176_v6, %s2048_s6  ;;  %s2070_s6 = smov 75  }
  0xf0   : > { %v892_v31 = vpop.permute.xlu1 %891  ;;  %v890_v32 = vpop.permute.xlu0 %889 }
  0xf1   : > { %898 = vst.msk [vmem:[#allocation2 + $0xe0] sm:$0xff] %vm883_vm5, %v892_v31  ;;  %897 = vst.msk [vmem:[#allocation2 + $0xb8] sm:$0xff] %vm883_vm5, %v890_v32 }
  0xf2   : > { %534 = vrot.lane.b32.xlu1 %v2133_v0, %s2055_s13  ;;  %526 = vrot.lane.b32.xlu0 %v2166_v4, %s2049_s7  ;;  %s2071_s7 = smov 58  }
  0xf4   : > { %v610_v33 = vpop.permute.xlu1 %609  ;;  %v608_v34 = vpop.permute.xlu0 %607 }
  0xf5   : > { %618 = vst.msk [vmem:[#allocation2 + $0xd0] sm:$0xff] %vm597_vm6, %v610_v33  ;;  %616 = vst.msk [vmem:[#allocation2 + $0xa8] sm:$0xff] %vm597_vm6, %v608_v34 }
  0xf6   : > { %619 = vst.msk [vmem:[#allocation2 + $0xd8] sm:$0xff] %vm599_vm7, %v610_v33  ;;  %617 = vst.msk [vmem:[#allocation2 + $0xb0] sm:$0xff] %vm599_vm7, %v608_v34  ;;  %935 = vrot.lane.b32.xlu1 %v2163_v3, %s2056_s14  ;;  %927 = vrot.lane.b32.xlu0 %v2183_v7, %s2050_s8  ;;  %s2072_s8 = smov 42  }
  0xf7   : > { %761 = vst.msk [vmem:[#allocation2 + $0xd8] sm:$0xff] %vm740_vm8, %v753_v23  ;;  %759 = vst.msk [vmem:[#allocation2 + $0xb0] sm:$0xff] %vm740_vm8, %v751_v24 }
  0xf8   : > { %v1011_v35 = vpop.permute.xlu1 %1010  ;;  %v1009_v36 = vpop.permute.xlu0 %1008 }
  0xf9   : > { %1019 = vst.msk [vmem:[#allocation2 + $0xe0] sm:$0xff] %vm998_vm9, %v1011_v35  ;;  %1017 = vst.msk [vmem:[#allocation2 + $0xb8] sm:$0xff] %vm998_vm9, %v1009_v36 }
  0xfa   : > { %1020 = vst.msk [vmem:[#allocation2 + $0xe8] sm:$0xff] %vm1000_vm10, %v1011_v35  ;;  %1018 = vst.msk [vmem:[#allocation2 + $0xc0] sm:$0xff] %vm1000_vm10, %v1009_v36  ;;  %665 = vrot.lane.b32.xlu1 %v2171_v5, %s2057_s18  ;;  %654 = vrot.lane.b32.xlu0 %v2163_v3, %s2051_s9  ;;  %s2073_s9 = smov 10  }
  0xfc   : > { %v365_v39 = vpop.permute.xlu1 %364  ;;  %v363_v40 = vpop.permute.xlu0 %362  ;;  %v1266_v41 = vld [vmem:[#allocation2 + $0xa8] sm:$0xff]  ;;  %v1271_v42 = vld [vmem:[#allocation2 + $0xd0] sm:$0xff] }
  0xfd   : > { %373 = vst.msk [vmem:[#allocation2 + $0x118] sm:$0xff] %vm339_vm1, %v365_v39  ;;  %371 = vst.msk [vmem:[#allocation2 + $0xf0] sm:$0xff] %vm339_vm1, %v363_v40  ;;  %v1753_v43 = vpack.c.bf16 %v1271_v42, %v1266_v41 }
  0xfe   : > { %374 = vst.msk [vmem:[#allocation2 + $0x120] sm:$0xff] %vm341_vm2, %v365_v39  ;;  %372 = vst.msk [vmem:[#allocation2 + $0xf8] sm:$0xff] %vm341_vm2, %v363_v40  ;;  %1066 = vrot.lane.b32.xlu1 %v2176_v6, %s2058_s19  ;;  %1055 = vrot.lane.b32.xlu0 %v2198_v8, %s2052_s10  ;;  %v1267_v45 = vld [vmem:[#allocation2 + $0xb0] sm:$0xff]  ;;  %v1272_v46 = vld [vmem:[#allocation2 + $0xd8] sm:$0xff]  ;;  %s2074_s10 = smov 122  }
  0xff   : > { %1754 = vmatprep.subr.bf16.mxu0 %v1753_v43  ;;  %v1807_v52 = vpack.c.bf16 %v1272_v46, %v1267_v45 }
 0x100   : > { %v766_v47 = vpop.permute.xlu1 %765  ;;  %v764_v48 = vpop.permute.xlu0 %763  ;;  %1756 = vmatpush1.bf16.msra.mxu0 %v1755_v44  ;;  %v1268_v49 = vld [vmem:[#allocation2 + $0xb8] sm:$0xff]  ;;  %v1273_v50 = vld [vmem:[#allocation2 + $0xe0] sm:$0xff] }
 0x101   : > { %775 = vst.msk [vmem:[#allocation2 + $0x130] sm:$0xff] %vm742_vm3, %v766_v47  ;;  %773 = vst.msk [vmem:[#allocation2 + $0x108] sm:$0xff] %vm742_vm3, %v764_v48  ;;  %v1805_v51 = vpack.c.bf16 %v1273_v50, %v1268_v49 }
 0x102   : > { %411 = vrot.lane.b32.xlu1 %v2171_v5, %s2053_s11  ;;  %409 = vrot.lane.b32.xlu0 %v2133_v0, %s2053_s11  ;;  %s2075_s11 = smov 90  }
 0x103   : > { %1806 = vmatprep.subr.bf16.mxu1 %v1805_v51 }
 0x104   : > { %v501_v53 = vpop.permute.xlu1 %500  ;;  %1808 = vmatpush1.bf16.msra.mxu1 %v1807_v52  ;;  %v499_v54 = vpop.permute.xlu0 %498  ;;  %v1275_v61 = vld [vmem:[#allocation2 + $0xf0] sm:$0xff]  ;;  %v1280_v62 = vld [vmem:[#allocation2 + $0x118] sm:$0xff] }
 0x105   : > { %508 = vst.msk [vmem:[#allocation2 + $0x120] sm:$0xff] %vm482_vm4, %v501_v53  ;;  %507 = vst.msk [vmem:[#allocation2 + $0xf8] sm:$0xff] %vm482_vm4, %v499_v54  ;;  %v1759_v12 = vpack.c.bf16 %v1280_v62, %v1275_v61 }
 0x106   : > { %812 = vrot.lane.b32.xlu1 %v2176_v6, %s2054_s12  ;;  %810 = vrot.lane.b32.xlu0 %v2163_v3, %s2054_s12  ;;  %s2076_s12 = smov 74  }
 0x108   : > { %v902_v55 = vpop.permute.xlu1 %901  ;;  %v900_v56 = vpop.permute.xlu0 %899 }
 0x109   : > { %909 = vst.msk [vmem:[#allocation2 + $0x130] sm:$0xff] %vm883_vm5, %v902_v55  ;;  %908 = vst.msk [vmem:[#allocation2 + $0x108] sm:$0xff] %vm883_vm5, %v900_v56 }
 0x10a   : > { %538 = vrot.lane.b32.xlu1 %v2166_v4, %s2055_s13  ;;  %536 = vrot.lane.b32.xlu0 %v2171_v5, %s2055_s13 }
 0x10c   : > { %v623_v57 = vpop.permute.xlu1 %622  ;;  %v621_v58 = vpop.permute.xlu0 %620 }
 0x10d   : > { %631 = vst.msk [vmem:[#allocation2 + $0x120] sm:$0xff] %vm597_vm6, %v623_v57  ;;  %629 = vst.msk [vmem:[#allocation2 + $0xf8] sm:$0xff] %vm597_vm6, %v621_v58 }
 0x10e   : > { %632 = vst.msk [vmem:[#allocation2 + $0x128] sm:$0xff] %vm599_vm7, %v623_v57  ;;  %630 = vst.msk [vmem:[#allocation2 + $0x100] sm:$0xff] %vm599_vm7, %v621_v58  ;;  %939 = vrot.lane.b32.xlu1 %v2183_v7, %s2056_s14  ;;  %937 = vrot.lane.b32.xlu0 %v2176_v6, %s2056_s14  ;;  %v2551_v57 = vld [vmem:[%s2130_s20 + $0x30] sm:$0xff] }
 0x10f   : > { %774 = vst.msk [vmem:[#allocation2 + $0x128] sm:$0xff] %vm740_vm8, %v766_v47  ;;  %772 = vst.msk [vmem:[#allocation2 + $0x100] sm:$0xff] %vm740_vm8, %v764_v48 }
 0x110   : > { %v1024_v59 = vpop.permute.xlu1 %1023  ;;  %v1022_v60 = vpop.permute.xlu0 %1021 }
 0x111   : > { %1032 = vst.msk [vmem:[#allocation2 + $0x130] sm:$0xff] %vm998_vm9, %v1024_v59  ;;  %1030 = vst.msk [vmem:[#allocation2 + $0x108] sm:$0xff] %vm998_vm9, %v1022_v60 }
 0x112   : > { %1033 = vst.msk [vmem:[#allocation2 + $0x138] sm:$0xff] %vm1000_vm10, %v1024_v59  ;;  %1031 = vst.msk [vmem:[#allocation2 + $0x110] sm:$0xff] %vm1000_vm10, %v1022_v60  ;;  %669 = vrot.lane.b32.xlu1 %v2163_v3, %s2057_s18  ;;  %667 = vrot.lane.b32.xlu0 %v2166_v4, %s2057_s18  ;;  %s2077_s18 = smov 48  }
 0x114   : > { %v378_v63 = vpop.permute.xlu1 %377  ;;  %v367_v1 = vpop.permute.xlu0 %366  ;;  %v1276_v9 = vld [vmem:[#allocation2 + $0xf8] sm:$0xff]  ;;  %v1281_v10 = vld [vmem:[#allocation2 + $0x120] sm:$0xff] }
 0x115   : > { %386 = vst.msk [vmem:[#allocation2 + $0x168] sm:$0xff] %vm339_vm1, %v378_v63  ;;  %375 = vst.msk [vmem:[#allocation2 + $0x140] sm:$0xff] %vm339_vm1, %v367_v1  ;;  %v1757_v11 = vpack.c.bf16 %v1281_v10, %v1276_v9 }
 0x116   : > { %387 = vst.msk [vmem:[#allocation2 + $0x170] sm:$0xff] %vm341_vm2, %v378_v63  ;;  %376 = vst.msk [vmem:[#allocation2 + $0x148] sm:$0xff] %vm341_vm2, %v367_v1  ;;  %1070 = vrot.lane.b32.xlu1 %v2198_v8, %s2058_s19  ;;  %1068 = vrot.lane.b32.xlu0 %v2183_v7, %s2058_s19  ;;  %v1277_v13 = vld [vmem:[#allocation2 + $0x100] sm:$0xff]  ;;  %v1282_v14 = vld [vmem:[#allocation2 + $0x128] sm:$0xff]  ;;  %s2078_s19 = smov 47  }
 0x117   : > { %1758 = vmatprep.subr.bf16.mxu0 %v1757_v11  ;;  %v1811_v20 = vpack.c.bf16 %v1282_v14, %v1277_v13  ;;  %v2560_v1 = vld [vmem:[%s2130_s20 + $0x18] sm:$0xff]  ;;  %v2571_v11 = vld [vmem:[%s2130_s20 + $0x28] sm:$0xff]  ;;  %v2578_v14 = vld [vmem:[%s2130_s20 + $0x20] sm:$0xff] }
 0x118   : > { %v779_v15 = vpop.permute.xlu1 %778  ;;  %v768_v16 = vpop.permute.xlu0 %767  ;;  %1760 = vmatpush1.bf16.msra.mxu0 %v1759_v12  ;;  %v1278_v17 = vld [vmem:[#allocation2 + $0x108] sm:$0xff]  ;;  %v1283_v18 = vld [vmem:[#allocation2 + $0x130] sm:$0xff] }
 0x119   : > { %788 = vst.msk [vmem:[#allocation2 + $0x180] sm:$0xff] %vm742_vm3, %v779_v15  ;;  %777 = vst.msk [vmem:[#allocation2 + $0x158] sm:$0xff] %vm742_vm3, %v768_v16  ;;  %v1809_v19 = vpack.c.bf16 %v1283_v18, %v1278_v17  ;;  %v2591_v17 = vld [vmem:[%s2130_s20 + $0x38] sm:$0xff] }
 0x11a   : > { %424 = vrot.lane.b32.xlu1 %v2133_v0, %s2059_s21  ;;  %422 = vrot.lane.b32.xlu0 %v2137_v2, %s2059_s21 }
 0x11b   : > { %1810 = vmatprep.subr.bf16.mxu1 %v1809_v19 }
 0x11c   : > { %v511_v21 = vpop.permute.xlu1 %510  ;;  %1812 = vmatpush1.bf16.msra.mxu1 %v1811_v20  ;;  %v503_v22 = vpop.permute.xlu0 %502  ;;  %v1285_v29 = vld [vmem:[#allocation2 + $0x140] sm:$0xff]  ;;  %v1290_v30 = vld [vmem:[#allocation2 + $0x168] sm:$0xff] }
 0x11d   : > { %519 = vst.msk [vmem:[#allocation2 + $0x170] sm:$0xff] %vm482_vm4, %v511_v21  ;;  %509 = vst.msk [vmem:[#allocation2 + $0x148] sm:$0xff] %vm482_vm4, %v503_v22  ;;  %v1763_v36 = vpack.c.bf16 %v1290_v30, %v1285_v29 }
 0x11e   : > { %825 = vrot.lane.b32.xlu1 %v2163_v3, %s2060_s22  ;;  %823 = vrot.lane.b32.xlu0 %v2166_v4, %s2060_s22 }
 0x120   : > { %v912_v23 = vpop.permute.xlu1 %911  ;;  %v904_v24 = vpop.permute.xlu0 %903 }
 0x121   : > { %920 = vst.msk [vmem:[#allocation2 + $0x180] sm:$0xff] %vm883_vm5, %v912_v23  ;;  %910 = vst.msk [vmem:[#allocation2 + $0x158] sm:$0xff] %vm883_vm5, %v904_v24 }
 0x122   : > { %548 = vrot.lane.b32.xlu1 %v2171_v5, %s2061_s23  ;;  %546 = vrot.lane.b32.xlu0 %v2133_v0, %s2061_s23 }
 0x124   : > { %v636_v25 = vpop.permute.xlu1 %635  ;;  %v625_v26 = vpop.permute.xlu0 %624 }
 0x125   : > { %644 = vst.msk [vmem:[#allocation2 + $0x170] sm:$0xff] %vm597_vm6, %v636_v25  ;;  %633 = vst.msk [vmem:[#allocation2 + $0x148] sm:$0xff] %vm597_vm6, %v625_v26 }
 0x126   : > { %645 = vst.msk [vmem:[#allocation2 + $0x178] sm:$0xff] %vm599_vm7, %v636_v25  ;;  %634 = vst.msk [vmem:[#allocation2 + $0x150] sm:$0xff] %vm599_vm7, %v625_v26  ;;  %949 = vrot.lane.b32.xlu1 %v2176_v6, %s2062_s24  ;;  %947 = vrot.lane.b32.xlu0 %v2163_v3, %s2062_s24 }
 0x127   : > { %787 = vst.msk [vmem:[#allocation2 + $0x178] sm:$0xff] %vm740_vm8, %v779_v15  ;;  %776 = vst.msk [vmem:[#allocation2 + $0x150] sm:$0xff] %vm740_vm8, %v768_v16 }
 0x128   : > { %v1037_v27 = vpop.permute.xlu1 %1036  ;;  %v1026_v28 = vpop.permute.xlu0 %1025 }
 0x129   : > { %1045 = vst.msk [vmem:[#allocation2 + $0x180] sm:$0xff] %vm998_vm9, %v1037_v27  ;;  %1034 = vst.msk [vmem:[#allocation2 + $0x158] sm:$0xff] %vm998_vm9, %v1026_v28 }
 0x12a   : > { %1046 = vst.msk [vmem:[#allocation2 + $0x188] sm:$0xff] %vm1000_vm10, %v1037_v27  ;;  %1035 = vst.msk [vmem:[#allocation2 + $0x160] sm:$0xff] %vm1000_vm10, %v1026_v28  ;;  %682 = vrot.lane.b32.xlu1 %v2166_v4, %s2063_s25  ;;  %680 = vrot.lane.b32.xlu0 %v2171_v5, %s2063_s25  ;;  %v2610_v27 = vld [vmem:[%s2130_s20 + $0x40] sm:$0xff] }
 0x12c   : > { %v382_v31 = vpop.permute.xlu1 %381  ;;  %v380_v32 = vpop.permute.xlu0 %379  ;;  %v1286_v33 = vld [vmem:[#allocation2 + $0x148] sm:$0xff]  ;;  %v1291_v34 = vld [vmem:[#allocation2 + $0x170] sm:$0xff] }
 0x12d   : > { %390 = vst.msk [vmem:[#allocation2 + $0x1b8] sm:$0xff] %vm339_vm1, %v382_v31  ;;  %388 = vst.msk [vmem:[#allocation2 + $0x190] sm:$0xff] %vm339_vm1, %v380_v32  ;;  %v1761_v35 = vpack.c.bf16 %v1291_v34, %v1286_v33 }
 0x12e   : > { %391 = vst.msk [vmem:[#allocation2 + $0x1c0] sm:$0xff] %vm341_vm2, %v382_v31  ;;  %389 = vst.msk [vmem:[#allocation2 + $0x198] sm:$0xff] %vm341_vm2, %v380_v32  ;;  %1083 = vrot.lane.b32.xlu1 %v2183_v7, %s2064_s26  ;;  %1081 = vrot.lane.b32.xlu0 %v2176_v6, %s2064_s26  ;;  %v1287_v37 = vld [vmem:[#allocation2 + $0x150] sm:$0xff]  ;;  %v1292_v38 = vld [vmem:[#allocation2 + $0x178] sm:$0xff] }
 0x12f   : > { %1762 = vmatprep.subr.bf16.mxu0 %v1761_v35  ;;  %v1815_v44 = vpack.c.bf16 %v1292_v38, %v1287_v37 }
 0x130   : > { %v783_v39 = vpop.permute.xlu1 %782  ;;  %v781_v40 = vpop.permute.xlu0 %780  ;;  %1764 = vmatpush1.bf16.msra.mxu0 %v1763_v36  ;;  %v1288_v41 = vld [vmem:[#allocation2 + $0x158] sm:$0xff]  ;;  %v1293_v42 = vld [vmem:[#allocation2 + $0x180] sm:$0xff] }
 0x131   : > { %792 = vst.msk [vmem:[#allocation2 + $0x1d0] sm:$0xff] %vm742_vm3, %v783_v39  ;;  %790 = vst.msk [vmem:[#allocation2 + $0x1a8] sm:$0xff] %vm742_vm3, %v781_v40  ;;  %v1813_v43 = vpack.c.bf16 %v1293_v42, %v1288_v41 }
 0x132   : > { %437 = vrot.lane.b32.xlu1 %v2137_v2, %s2065_s27  ;;  %426 = vrot.lane.b32.xlu0 %v2171_v5, %s2059_s21  ;;  %s2080_s21 = smov 38  }
 0x133   : > { %1814 = vmatprep.subr.bf16.mxu1 %v1813_v43 }
 0x134   : > { %v515_v45 = vpop.permute.xlu1 %514  ;;  %1816 = vmatpush1.bf16.msra.mxu1 %v1815_v44  ;;  %v513_v46 = vpop.permute.xlu0 %512  ;;  %v1295_v51 = vld [vmem:[#allocation2 + $0x190] sm:$0xff] }
 0x135   : > { %521 = vst.msk [vmem:[#allocation2 + $0x1c0] sm:$0xff] %vm482_vm4, %v515_v45  ;;  %520 = vst.msk [vmem:[#allocation2 + $0x198] sm:$0xff] %vm482_vm4, %v513_v46 }
 0x136   : > { %838 = vrot.lane.b32.xlu1 %v2166_v4, %s2066_s28  ;;  %827 = vrot.lane.b32.xlu0 %v2176_v6, %s2060_s22  ;;  %s2081_s22 = smov 37  }
 0x138   : > { %v916_v47 = vpop.permute.xlu1 %915  ;;  %v914_v48 = vpop.permute.xlu0 %913 }
 0x139   : > { %922 = vst.msk [vmem:[#allocation2 + $0x1d0] sm:$0xff] %vm883_vm5, %v916_v47  ;;  %921 = vst.msk [vmem:[#allocation2 + $0x1a8] sm:$0xff] %vm883_vm5, %v914_v48 }
 0x13a   : > { %558 = vrot.lane.b32.xlu1 %v2133_v0, %s2067_s29  ;;  %550 = vrot.lane.b32.xlu0 %v2166_v4, %s2061_s23  ;;  %s2082_s23 = smov 36  }
 0x13c   : > { %v640_v49 = vpop.permute.xlu1 %639  ;;  %v638_v50 = vpop.permute.xlu0 %637 }
 0x13d   : > { %648 = vst.msk [vmem:[#allocation2 + $0x1c0] sm:$0xff] %vm597_vm6, %v640_v49  ;;  %646 = vst.msk [vmem:[#allocation2 + $0x198] sm:$0xff] %vm597_vm6, %v638_v50 }
 0x13e   : > { %649 = vst.msk [vmem:[#allocation2 + $0x1c8] sm:$0xff] %vm599_vm7, %v640_v49  ;;  %647 = vst.msk [vmem:[#allocation2 + $0x1a0] sm:$0xff] %vm599_vm7, %v638_v50  ;;  %959 = vrot.lane.b32.xlu1 %v2163_v3, %s2068_s30  ;;  %951 = vrot.lane.b32.xlu0 %v2183_v7, %s2062_s24  ;;  %v1300_v7 = vld [vmem:[#allocation2 + $0x1b8] sm:$0xff]  ;;  %s2083_s24 = smov 28  }
 0x13f   : > { %791 = vst.msk [vmem:[#allocation2 + $0x1c8] sm:$0xff] %vm740_vm8, %v783_v39  ;;  %789 = vst.msk [vmem:[#allocation2 + $0x1a0] sm:$0xff] %vm740_vm8, %v781_v40 }
 0x140   : > { %v1041_v4 = vpop.permute.xlu1 %1040  ;;  %v1039_v6 = vpop.permute.xlu0 %1038 }
 0x141   : > { %1049 = vst.msk [vmem:[#allocation2 + $0x1d0] sm:$0xff] %vm998_vm9, %v1041_v4  ;;  %1047 = vst.msk [vmem:[#allocation2 + $0x1a8] sm:$0xff] %vm998_vm9, %v1039_v6 }
 0x142   : > { %1050 = vst.msk [vmem:[#allocation2 + $0x1d8] sm:$0xff] %vm1000_vm10, %v1041_v4  ;;  %1048 = vst.msk [vmem:[#allocation2 + $0x1b0] sm:$0xff] %vm1000_vm10, %v1039_v6  ;;  %695 = vrot.lane.b32.xlu1 %v2171_v5, %s2069_s5  ;;  %684 = vrot.lane.b32.xlu0 %v2163_v3, %s2063_s25  ;;  %v1767_v3 = vpack.c.bf16 %v1300_v7, %v1295_v51  ;;  %s2084_s25 = smov 27  }
 0x144   : > { %v395_v52 = vpop.permute.xlu1 %394  ;;  %v393_v53 = vpop.permute.xlu0 %392  ;;  %v1296_v54 = vld [vmem:[#allocation2 + $0x198] sm:$0xff]  ;;  %v1301_v55 = vld [vmem:[#allocation2 + $0x1c0] sm:$0xff] }
 0x145   : > { %403 = vst.msk [vmem:[#allocation2 + $0x208] sm:$0xff] %vm339_vm1, %v395_v52  ;;  %401 = vst.msk [vmem:[#allocation2 + $0x1e0] sm:$0xff] %vm339_vm1, %v393_v53  ;;  %v1765_v56 = vpack.c.bf16 %v1301_v55, %v1296_v54 }
 0x146   : > { %404 = vst.msk [vmem:[#allocation2 + $0x210] sm:$0xff] %vm341_vm2, %v395_v52  ;;  %402 = vst.msk [vmem:[#allocation2 + $0x1e8] sm:$0xff] %vm341_vm2, %v393_v53  ;;  %1096 = vrot.lane.b32.xlu1 %v2551_v57, %s2070_s6  ;;  %1085 = vrot.lane.b32.xlu0 %v2198_v8, %s2064_s26  ;;  %v1297_v5 = vld [vmem:[#allocation2 + $0x1a0] sm:$0xff]  ;;  %v1302_v58 = vld [vmem:[#allocation2 + $0x1c8] sm:$0xff]  ;;  %s2085_s26 = smov 26  }
 0x147   : > { %1766 = vmatprep.subr.bf16.mxu0 %v1765_v56  ;;  %v1819_v8 = vpack.c.bf16 %v1302_v58, %v1297_v5  ;;  %v2675_v58 = vld [vmem:[%s2931_s1 + $0x8] sm:$0xff] }
 0x148   : > { %v796_v59 = vpop.permute.xlu1 %795  ;;  %v794_v60 = vpop.permute.xlu0 %793  ;;  %1768 = vmatpush1.bf16.msra.mxu0 %v1767_v3  ;;  %v1298_v61 = vld [vmem:[#allocation2 + $0x1a8] sm:$0xff]  ;;  %v1303_v62 = vld [vmem:[#allocation2 + $0x1d0] sm:$0xff]  ;;  %1736 = vmatprep.mubr.msk.f32.mxu0 %vm1392_vm11, %v2675_v58 }
 0x149   : > { %805 = vst.msk [vmem:[#allocation2 + $0x220] sm:$0xff] %vm742_vm3, %v796_v59  ;;  %803 = vst.msk [vmem:[#allocation2 + $0x1f8] sm:$0xff] %vm742_vm3, %v794_v60  ;;  %v1817_v63 = vpack.c.bf16 %v1303_v62, %v1298_v61  ;;  %1738 = vmatprep.mubr.msk.f32.mxu1 %vm1392_vm11, %v2675_v58 }
 0x14a   : > { %441 = vrot.lane.b32.xlu1 %v2560_v1, %s2065_s27  ;;  %439 = vrot.lane.b32.xlu0 %v2133_v0, %s2065_s27 }
 0x14b   : > { %1818 = vmatprep.subr.bf16.mxu1 %v1817_v63  ;;  %v2702_v63 = vld [vmem:[%s2130_s20 + $0x48] sm:$0xff] }
 0x14c   : > { %v525_v9 = vpop.permute.xlu1 %524  ;;  %1820 = vmatpush1.bf16.msra.mxu1 %v1819_v8  ;;  %v523_v10 = vpop.permute.xlu0 %522  ;;  %v1305_v20 = vld [vmem:[#allocation2 + $0x1e0] sm:$0xff]  ;;  %v1310_v21 = vld [vmem:[#allocation2 + $0x208] sm:$0xff] }
 0x14d   : > { %532 = vst.msk [vmem:[#allocation2 + $0x210] sm:$0xff] %vm482_vm4, %v525_v9  ;;  %531 = vst.msk [vmem:[#allocation2 + $0x1e8] sm:$0xff] %vm482_vm4, %v523_v10  ;;  %v1771_v28 = vpack.c.bf16 %v1310_v21, %v1305_v20 }
 0x14e   : > { %842 = vrot.lane.b32.xlu1 %v2551_v57, %s2066_s28  ;;  %840 = vrot.lane.b32.xlu0 %v2571_v11, %s2066_s28 }
 0x150   : > { %v926_v12 = vpop.permute.xlu1 %925  ;;  %v924_v13 = vpop.permute.xlu0 %923 }
 0x151   : > { %933 = vst.msk [vmem:[#allocation2 + $0x220] sm:$0xff] %vm883_vm5, %v926_v12  ;;  %932 = vst.msk [vmem:[#allocation2 + $0x1f8] sm:$0xff] %vm883_vm5, %v924_v13 }
 0x152   : > { %562 = vrot.lane.b32.xlu1 %v2578_v14, %s2067_s29  ;;  %560 = vrot.lane.b32.xlu0 %v2560_v1, %s2067_s29  ;;  %s1744_s29 = sshll.u32 %s2936_s16, 4 }
 0x154   : > { %v653_v15 = vpop.permute.xlu1 %652  ;;  %v651_v16 = vpop.permute.xlu0 %650 }
 0x155   : > { %661 = vst.msk [vmem:[#allocation2 + $0x210] sm:$0xff] %vm597_vm6, %v653_v15  ;;  %659 = vst.msk [vmem:[#allocation2 + $0x1e8] sm:$0xff] %vm597_vm6, %v651_v16 }
 0x156   : > { %662 = vst.msk [vmem:[#allocation2 + $0x218] sm:$0xff] %vm599_vm7, %v653_v15  ;;  %660 = vst.msk [vmem:[#allocation2 + $0x1f0] sm:$0xff] %vm599_vm7, %v651_v16  ;;  %963 = vrot.lane.b32.xlu1 %v2591_v17, %s2068_s30  ;;  %961 = vrot.lane.b32.xlu0 %v2551_v57, %s2068_s30 }
 0x157   : > { %804 = vst.msk [vmem:[#allocation2 + $0x218] sm:$0xff] %vm740_vm8, %v796_v59  ;;  %802 = vst.msk [vmem:[#allocation2 + $0x1f0] sm:$0xff] %vm740_vm8, %v794_v60  ;;  %v2688_v59 = vld [vmem:[%s2130_s20 + $0x40] sm:$0xff]  ;;  %v2691_v60 = vld [vmem:[%s2130_s20 + $0x38] sm:$0xff]  ;;  %s2079_s20 = smov 46  }
 0x158   : > { %v1054_v18 = vpop.permute.xlu1 %1053  ;;  %v1052_v19 = vpop.permute.xlu0 %1051 }
 0x159   : > { %1062 = vst.msk [vmem:[#allocation2 + $0x220] sm:$0xff] %vm998_vm9, %v1054_v18  ;;  %1060 = vst.msk [vmem:[#allocation2 + $0x1f8] sm:$0xff] %vm998_vm9, %v1052_v19 }
 0x15a   : > { %1063 = vst.msk [vmem:[#allocation2 + $0x228] sm:$0xff] %vm1000_vm10, %v1054_v18  ;;  %1061 = vst.msk [vmem:[#allocation2 + $0x200] sm:$0xff] %vm1000_vm10, %v1052_v19  ;;  %699 = vrot.lane.b32.xlu1 %v2571_v11, %s2069_s5  ;;  %697 = vrot.lane.b32.xlu0 %v2578_v14, %s2069_s5 }
 0x15c   : > { %v408_v22 = vpop.permute.xlu1 %407  ;;  %v397_v23 = vpop.permute.xlu0 %396  ;;  %v1306_v24 = vld [vmem:[#allocation2 + $0x1e8] sm:$0xff]  ;;  %v1311_v25 = vld [vmem:[#allocation2 + $0x210] sm:$0xff] }
 0x15d   : > { %416 = vst.msk [vmem:[#allocation2 + $0x258] sm:$0xff] %vm339_vm1, %v408_v22  ;;  %405 = vst.msk [vmem:[#allocation2 + $0x230] sm:$0xff] %vm339_vm1, %v397_v23  ;;  %v1769_v26 = vpack.c.bf16 %v1311_v25, %v1306_v24 }
 0x15e   : > { %417 = vst.msk [vmem:[#allocation2 + $0x260] sm:$0xff] %vm341_vm2, %v408_v22  ;;  %406 = vst.msk [vmem:[#allocation2 + $0x238] sm:$0xff] %vm341_vm2, %v397_v23  ;;  %1100 = vrot.lane.b32.xlu1 %v2610_v27, %s2070_s6  ;;  %1098 = vrot.lane.b32.xlu0 %v2591_v17, %s2070_s6  ;;  %v1307_v29 = vld [vmem:[#allocation2 + $0x1f0] sm:$0xff]  ;;  %v1312_v30 = vld [vmem:[#allocation2 + $0x218] sm:$0xff]  ;;  %s212_s6 = scalar_lea.vmem %s2933_s3, %s1744_s29 }
 0x15f   : > { %1770 = vmatprep.subr.bf16.mxu0 %v1769_v26  ;;  %v1823_v36 = vpack.c.bf16 %v1312_v30, %v1307_v29 }
 0x160   : > { %v809_v31 = vpop.permute.xlu1 %808  ;;  %v798_v32 = vpop.permute.xlu0 %797  ;;  %1772 = vmatpush1.bf16.msra.mxu0 %v1771_v28  ;;  %v1308_v33 = vld [vmem:[#allocation2 + $0x1f8] sm:$0xff]  ;;  %v1313_v34 = vld [vmem:[#allocation2 + $0x220] sm:$0xff] }
 0x161   : > { %818 = vst.msk [vmem:[#allocation2 + $0x270] sm:$0xff] %vm742_vm3, %v809_v31  ;;  %807 = vst.msk [vmem:[#allocation2 + $0x248] sm:$0xff] %vm742_vm3, %v798_v32  ;;  %v1821_v35 = vpack.c.bf16 %v1313_v34, %v1308_v33 }
 0x162   : > { %454 = vrot.lane.b32.xlu1 %v2133_v0, %s2071_s7  ;;  %452 = vrot.lane.b32.xlu0 %v2137_v2, %s2071_s7 }
 0x163   : > { %1822 = vmatprep.subr.bf16.mxu1 %v1821_v35 }
 0x164   : > { %v535_v37 = vpop.permute.xlu1 %534  ;;  %1824 = vmatpush1.bf16.msra.mxu1 %v1823_v36  ;;  %v527_v38 = vpop.permute.xlu0 %526  ;;  %v1315_v43 = vld [vmem:[#allocation2 + $0x230] sm:$0xff]  ;;  %v1320_v44 = vld [vmem:[#allocation2 + $0x258] sm:$0xff] }
 0x165   : > { %543 = vst.msk [vmem:[#allocation2 + $0x260] sm:$0xff] %vm482_vm4, %v535_v37  ;;  %533 = vst.msk [vmem:[#allocation2 + $0x238] sm:$0xff] %vm482_vm4, %v527_v38  ;;  %v1775_v50 = vpack.c.bf16 %v1320_v44, %v1315_v43 }
 0x166   : > { %855 = vrot.lane.b32.xlu1 %v2571_v11, %s2072_s8  ;;  %853 = vrot.lane.b32.xlu0 %v2578_v14, %s2072_s8 }
 0x168   : > { %v936_v39 = vpop.permute.xlu1 %935  ;;  %v928_v40 = vpop.permute.xlu0 %927 }
 0x169   : > { %944 = vst.msk [vmem:[#allocation2 + $0x270] sm:$0xff] %vm883_vm5, %v936_v39  ;;  %934 = vst.msk [vmem:[#allocation2 + $0x248] sm:$0xff] %vm883_vm5, %v928_v40 }
 0x16a   : > { %572 = vrot.lane.b32.xlu1 %v2560_v1, %s2073_s9  ;;  %570 = vrot.lane.b32.xlu0 %v2133_v0, %s2073_s9 }
 0x16c   : > { %v666_v2 = vpop.permute.xlu1 %665  ;;  %v655_v41 = vpop.permute.xlu0 %654 }
 0x16d   : > { %674 = vst.msk [vmem:[#allocation2 + $0x260] sm:$0xff] %vm597_vm6, %v666_v2  ;;  %663 = vst.msk [vmem:[#allocation2 + $0x238] sm:$0xff] %vm597_vm6, %v655_v41 }
 0x16e   : > { %675 = vst.msk [vmem:[#allocation2 + $0x268] sm:$0xff] %vm599_vm7, %v666_v2  ;;  %664 = vst.msk [vmem:[#allocation2 + $0x240] sm:$0xff] %vm599_vm7, %v655_v41  ;;  %973 = vrot.lane.b32.xlu1 %v2551_v57, %s2074_s10  ;;  %971 = vrot.lane.b32.xlu0 %v2571_v11, %s2074_s10 }
 0x16f   : > { %817 = vst.msk [vmem:[#allocation2 + $0x268] sm:$0xff] %vm740_vm8, %v809_v31  ;;  %806 = vst.msk [vmem:[#allocation2 + $0x240] sm:$0xff] %vm740_vm8, %v798_v32 }
 0x170   : > { %v1067_v0 = vpop.permute.xlu1 %1066  ;;  %v1056_v42 = vpop.permute.xlu0 %1055 }
 0x171   : > { %1075 = vst.msk [vmem:[#allocation2 + $0x270] sm:$0xff] %vm998_vm9, %v1067_v0  ;;  %1064 = vst.msk [vmem:[#allocation2 + $0x248] sm:$0xff] %vm998_vm9, %v1056_v42 }
 0x172   : > { %1076 = vst.msk [vmem:[#allocation2 + $0x278] sm:$0xff] %vm1000_vm10, %v1067_v0  ;;  %1065 = vst.msk [vmem:[#allocation2 + $0x250] sm:$0xff] %vm1000_vm10, %v1056_v42  ;;  %712 = vrot.lane.b32.xlu1 %v2578_v14, %s2075_s11  ;;  %710 = vrot.lane.b32.xlu0 %v2560_v1, %s2075_s11 }
 0x174   : > { %v412_v45 = vpop.permute.xlu1 %411  ;;  %v410_v46 = vpop.permute.xlu0 %409  ;;  %v1316_v47 = vld [vmem:[#allocation2 + $0x238] sm:$0xff]  ;;  %v1321_v48 = vld [vmem:[#allocation2 + $0x260] sm:$0xff] }
 0x175   : > { %420 = vst.msk [vmem:[#allocation2 + $0x2a8] sm:$0xff] %vm339_vm1, %v412_v45  ;;  %418 = vst.msk [vmem:[#allocation2 + $0x280] sm:$0xff] %vm339_vm1, %v410_v46  ;;  %v1773_v49 = vpack.c.bf16 %v1321_v48, %v1316_v47 }
 0x176   : > { %421 = vst.msk [vmem:[#allocation2 + $0x2b0] sm:$0xff] %vm341_vm2, %v412_v45  ;;  %419 = vst.msk [vmem:[#allocation2 + $0x288] sm:$0xff] %vm341_vm2, %v410_v46  ;;  %1113 = vrot.lane.b32.xlu1 %v2591_v17, %s2076_s12  ;;  %1111 = vrot.lane.b32.xlu0 %v2551_v57, %s2076_s12  ;;  %v1317_v4 = vld [vmem:[#allocation2 + $0x240] sm:$0xff]  ;;  %v1322_v6 = vld [vmem:[#allocation2 + $0x268] sm:$0xff] }
 0x177   : > { %1774 = vmatprep.subr.bf16.mxu0 %v1773_v49  ;;  %v1827_v55 = vpack.c.bf16 %v1322_v6, %v1317_v4 }
 0x178   : > { %v813_v51 = vpop.permute.xlu1 %812  ;;  %v811_v7 = vpop.permute.xlu0 %810  ;;  %1776 = vmatpush1.bf16.msra.mxu0 %v1775_v50  ;;  %v1318_v52 = vld [vmem:[#allocation2 + $0x248] sm:$0xff]  ;;  %v1323_v53 = vld [vmem:[#allocation2 + $0x270] sm:$0xff] }
 0x179   : > { %822 = vst.msk [vmem:[#allocation2 + $0x2c0] sm:$0xff] %vm742_vm3, %v813_v51  ;;  %820 = vst.msk [vmem:[#allocation2 + $0x298] sm:$0xff] %vm742_vm3, %v811_v7  ;;  %v1825_v54 = vpack.c.bf16 %v1323_v53, %v1318_v52  ;;  %v1380_v52 = vld [vmem:[%s2932_s2] sm:$0xff]  ;;  %v2086_v53 = vmov 0  }
 0x17a   : > { %857 = vrot.lane.b32.xlu1 %v2551_v57, %s2072_s8  ;;  %456 = vrot.lane.b32.xlu0 %v2560_v1, %s2071_s7 }
 0x17b   : > { %1826 = vmatprep.subr.bf16.mxu1 %v1825_v54  ;;  %1999 = vset.pattern.permute.xlu1 %v2086_v53 }
 0x17c   : > { %v539_v56 = vpop.permute.xlu1 %538  ;;  %1828 = vmatpush1.bf16.msra.mxu1 %v1827_v55  ;;  %v537_v3 = vpop.permute.xlu0 %536  ;;  %v1325_v9 = vld [vmem:[#allocation2 + $0x280] sm:$0xff]  ;;  %v1330_v10 = vld [vmem:[#allocation2 + $0x2a8] sm:$0xff]  ;;  %2000 = vset.pattern.permute.xlu0 %v2086_v53 }
 0x17d   : > { %545 = vst.msk [vmem:[#allocation2 + $0x2b0] sm:$0xff] %vm482_vm4, %v539_v56  ;;  %544 = vst.msk [vmem:[#allocation2 + $0x288] sm:$0xff] %vm482_vm4, %v537_v3  ;;  %v1779_v16 = vpack.c.bf16 %v1330_v10, %v1325_v9  ;;  %v1628_v56 = vld [vmem:[%s212_s6] sm:$0xff]  ;;  %v1381_v3 = vld [vmem:[%s2932_s2 + $0x8] sm:$0xff] }
 0x17e   : > { %975 = vrot.lane.b32.xlu1 %v2591_v17, %s2074_s10  ;;  %574 = vrot.lane.b32.xlu0 %v2578_v14, %s2073_s9 }
 0x180   : > { %v940_v57 = vpop.permute.xlu1 %939  ;;  %v938_v5 = vpop.permute.xlu0 %937 }
 0x181   : > { %946 = vst.msk [vmem:[#allocation2 + $0x2c0] sm:$0xff] %vm883_vm5, %v940_v57  ;;  %945 = vst.msk [vmem:[#allocation2 + $0x298] sm:$0xff] %vm883_vm5, %v938_v5 }
 0x182   : > { %1115 = vrot.lane.b32.xlu1 %v2610_v27, %s2076_s12  ;;  %714 = vrot.lane.b32.xlu0 %v2571_v11, %s2075_s11 }
 0x184   : > { %v670_v61 = vpop.permute.xlu1 %669  ;;  %v668_v62 = vpop.permute.xlu0 %667 }
 0x185   : > { %678 = vst.msk [vmem:[#allocation2 + $0x2b0] sm:$0xff] %vm597_vm6, %v670_v61  ;;  %676 = vst.msk [vmem:[#allocation2 + $0x288] sm:$0xff] %vm597_vm6, %v668_v62 }
 0x186   : > { %679 = vst.msk [vmem:[#allocation2 + $0x2b8] sm:$0xff] %vm599_vm7, %v670_v61  ;;  %677 = vst.msk [vmem:[#allocation2 + $0x290] sm:$0xff] %vm599_vm7, %v668_v62  ;;  %1134 = vrot.lane.b32.xlu1 %v2688_v59, %s2077_s18  ;;  %1132 = vrot.lane.b32.xlu0 %v2691_v60, %s2077_s18 }
 0x187   : > { %821 = vst.msk [vmem:[#allocation2 + $0x2b8] sm:$0xff] %vm740_vm8, %v813_v51  ;;  %819 = vst.msk [vmem:[#allocation2 + $0x290] sm:$0xff] %vm740_vm8, %v811_v7 }
 0x188   : > { %v1071_v1 = vpop.permute.xlu1 %1070  ;;  %v1069_v8 = vpop.permute.xlu0 %1068 }
 0x189   : > { %1079 = vst.msk [vmem:[#allocation2 + $0x2c0] sm:$0xff] %vm998_vm9, %v1071_v1  ;;  %1077 = vst.msk [vmem:[#allocation2 + $0x298] sm:$0xff] %vm998_vm9, %v1069_v8 }
 0x18a   : > { %1080 = vst.msk [vmem:[#allocation2 + $0x2c8] sm:$0xff] %vm1000_vm10, %v1071_v1  ;;  %1078 = vst.msk [vmem:[#allocation2 + $0x2a0] sm:$0xff] %vm1000_vm10, %v1069_v8  ;;  %1145 = vrot.lane.b32.xlu1 %v2691_v60, %s2078_s19  ;;  %1136 = vrot.lane.b32.xlu0 %v2702_v63, %s2077_s18  ;;  %v1629_v8 = vld [vmem:[%s212_s6 + $0x8] sm:$0xff] }
 0x18c   : > { %v425_v11 = vpop.permute.xlu1 %424  ;;  %v423_v12 = vpop.permute.xlu0 %422  ;;  %v1326_v13 = vld [vmem:[#allocation2 + $0x288] sm:$0xff]  ;;  %v1331_v14 = vld [vmem:[#allocation2 + $0x2b0] sm:$0xff] }
 0x18d   : > { %433 = vst.msk [vmem:[#allocation2 + $0x2f8] sm:$0xff] %vm339_vm1, %v425_v11  ;;  %431 = vst.msk [vmem:[#allocation2 + $0x2d0] sm:$0xff] %vm339_vm1, %v423_v12  ;;  %v1777_v15 = vpack.c.bf16 %v1331_v14, %v1326_v13 }
 0x18e   : > { %434 = vst.msk [vmem:[#allocation2 + $0x300] sm:$0xff] %vm341_vm2, %v425_v11  ;;  %432 = vst.msk [vmem:[#allocation2 + $0x2d8] sm:$0xff] %vm341_vm2, %v423_v12  ;;  %1149 = vrot.lane.b32.xlu1 %v2702_v63, %s2078_s19  ;;  %1147 = vrot.lane.b32.xlu0 %v2688_v59, %s2078_s19  ;;  %v1327_v17 = vld [vmem:[#allocation2 + $0x290] sm:$0xff]  ;;  %v1332_v18 = vld [vmem:[#allocation2 + $0x2b8] sm:$0xff] }
 0x18f   : > { %1778 = vmatprep.subr.bf16.mxu0 %v1777_v15  ;;  %v1831_v24 = vpack.c.bf16 %v1332_v18, %v1327_v17 }
 0x190   : > { %v826_v19 = vpop.permute.xlu1 %825  ;;  %v824_v20 = vpop.permute.xlu0 %823  ;;  %1780 = vmatpush1.bf16.msra.mxu0 %v1779_v16  ;;  %v1328_v21 = vld [vmem:[#allocation2 + $0x298] sm:$0xff]  ;;  %v1333_v22 = vld [vmem:[#allocation2 + $0x2c0] sm:$0xff] }
 0x191   : > { %835 = vst.msk [vmem:[#allocation2 + $0x310] sm:$0xff] %vm742_vm3, %v826_v19  ;;  %833 = vst.msk [vmem:[#allocation2 + $0x2e8] sm:$0xff] %vm742_vm3, %v824_v20  ;;  %v1829_v23 = vpack.c.bf16 %v1333_v22, %v1328_v21 }
 0x192   : > { %1159 = vrot.lane.b32.xlu1 %v2688_v59, %s2079_s20  ;;  %1157 = vrot.lane.b32.xlu0 %v2691_v60, %s2079_s20 }
 0x193   : > { %1830 = vmatprep.subr.bf16.mxu1 %v1829_v23 }
 0x194   : > { %v549_v25 = vpop.permute.xlu1 %548  ;;  %1832 = vmatpush1.bf16.msra.mxu1 %v1831_v24  ;;  %v547_v26 = vpop.permute.xlu0 %546  ;;  %v1335_v33 = vld [vmem:[#allocation2 + $0x2d0] sm:$0xff]  ;;  %v1340_v34 = vld [vmem:[#allocation2 + $0x2f8] sm:$0xff] }
 0x195   : > { %556 = vst.msk [vmem:[#allocation2 + $0x300] sm:$0xff] %vm482_vm4, %v549_v25  ;;  %555 = vst.msk [vmem:[#allocation2 + $0x2d8] sm:$0xff] %vm482_vm4, %v547_v26  ;;  %v1783_v40 = vpack.c.bf16 %v1340_v34, %v1335_v33 }
 0x196   : > { %1169 = vrot.lane.b32.xlu1 %v2691_v60, %s2080_s21  ;;  %1161 = vrot.lane.b32.xlu0 %v2702_v63, %s2079_s20  ;;  %s2915_s20 = scalar_lea.vmem %s2934_s4, %s1916_s17 }
 0x198   : > { %v950_v27 = vpop.permute.xlu1 %949  ;;  %v948_v28 = vpop.permute.xlu0 %947 }
 0x199   : > { %957 = vst.msk [vmem:[#allocation2 + $0x310] sm:$0xff] %vm883_vm5, %v950_v27  ;;  %956 = vst.msk [vmem:[#allocation2 + $0x2e8] sm:$0xff] %vm883_vm5, %v948_v28 }
 0x19a   : > { %1173 = vrot.lane.b32.xlu1 %v2702_v63, %s2080_s21  ;;  %1171 = vrot.lane.b32.xlu0 %v2688_v59, %s2080_s21 }
 0x19c   : > { %v683_v29 = vpop.permute.xlu1 %682  ;;  %v681_v30 = vpop.permute.xlu0 %680 }
 0x19d   : > { %691 = vst.msk [vmem:[#allocation2 + $0x300] sm:$0xff] %vm597_vm6, %v683_v29  ;;  %689 = vst.msk [vmem:[#allocation2 + $0x2d8] sm:$0xff] %vm597_vm6, %v681_v30 }
 0x19e   : > { %692 = vst.msk [vmem:[#allocation2 + $0x308] sm:$0xff] %vm599_vm7, %v683_v29  ;;  %690 = vst.msk [vmem:[#allocation2 + $0x2e0] sm:$0xff] %vm599_vm7, %v681_v30  ;;  %1183 = vrot.lane.b32.xlu1 %v2688_v59, %s2081_s22  ;;  %1181 = vrot.lane.b32.xlu0 %v2691_v60, %s2081_s22 }
 0x19f   : > { %834 = vst.msk [vmem:[#allocation2 + $0x308] sm:$0xff] %vm740_vm8, %v826_v19  ;;  %832 = vst.msk [vmem:[#allocation2 + $0x2e0] sm:$0xff] %vm740_vm8, %v824_v20 }
 0x1a0   : > { %v1084_v31 = vpop.permute.xlu1 %1083  ;;  %v1082_v32 = vpop.permute.xlu0 %1081 }
 0x1a1   : > { %1092 = vst.msk [vmem:[#allocation2 + $0x310] sm:$0xff] %vm998_vm9, %v1084_v31  ;;  %1090 = vst.msk [vmem:[#allocation2 + $0x2e8] sm:$0xff] %vm998_vm9, %v1082_v32 }
 0x1a2   : > { %1093 = vst.msk [vmem:[#allocation2 + $0x318] sm:$0xff] %vm1000_vm10, %v1084_v31  ;;  %1091 = vst.msk [vmem:[#allocation2 + $0x2f0] sm:$0xff] %vm1000_vm10, %v1082_v32  ;;  %1193 = vrot.lane.b32.xlu1 %v2691_v60, %s2082_s23  ;;  %1185 = vrot.lane.b32.xlu0 %v2702_v63, %s2081_s22 }
 0x1a4   : > { %v438_v35 = vpop.permute.xlu1 %437  ;;  %v427_v36 = vpop.permute.xlu0 %426  ;;  %v1336_v37 = vld [vmem:[#allocation2 + $0x2d8] sm:$0xff]  ;;  %v1341_v38 = vld [vmem:[#allocation2 + $0x300] sm:$0xff] }
 0x1a5   : > { %446 = vst.msk [vmem:[#allocation2 + $0x348] sm:$0xff] %vm339_vm1, %v438_v35  ;;  %435 = vst.msk [vmem:[#allocation2 + $0x320] sm:$0xff] %vm339_vm1, %v427_v36  ;;  %v1781_v39 = vpack.c.bf16 %v1341_v38, %v1336_v37 }
 0x1a6   : > { %447 = vst.msk [vmem:[#allocation2 + $0x350] sm:$0xff] %vm341_vm2, %v438_v35  ;;  %436 = vst.msk [vmem:[#allocation2 + $0x328] sm:$0xff] %vm341_vm2, %v427_v36  ;;  %1197 = vrot.lane.b32.xlu1 %v2702_v63, %s2082_s23  ;;  %1195 = vrot.lane.b32.xlu0 %v2688_v59, %s2082_s23  ;;  %v1337_v2 = vld [vmem:[#allocation2 + $0x2e0] sm:$0xff]  ;;  %v1342_v41 = vld [vmem:[#allocation2 + $0x308] sm:$0xff] }
 0x1a7   : > { %1782 = vmatprep.subr.bf16.mxu0 %v1781_v39  ;;  %v1835_v46 = vpack.c.bf16 %v1342_v41, %v1337_v2 }
 0x1a8   : > { %v839_v0 = vpop.permute.xlu1 %838  ;;  %v828_v42 = vpop.permute.xlu0 %827  ;;  %1784 = vmatpush1.bf16.msra.mxu0 %v1783_v40  ;;  %v1338_v43 = vld [vmem:[#allocation2 + $0x2e8] sm:$0xff]  ;;  %v1343_v44 = vld [vmem:[#allocation2 + $0x310] sm:$0xff] }
 0x1a9   : > { %848 = vst.msk [vmem:[#allocation2 + $0x360] sm:$0xff] %vm742_vm3, %v839_v0  ;;  %837 = vst.msk [vmem:[#allocation2 + $0x338] sm:$0xff] %vm742_vm3, %v828_v42  ;;  %v1833_v45 = vpack.c.bf16 %v1343_v44, %v1338_v43 }
 0x1aa   : > { %1207 = vrot.lane.b32.xlu1 %v2688_v59, %s2083_s24  ;;  %1205 = vrot.lane.b32.xlu0 %v2691_v60, %s2083_s24 }
 0x1ab   : > { %1834 = vmatprep.subr.bf16.mxu1 %v1833_v45 }
 0x1ac   : > { %v559_v47 = vpop.permute.xlu1 %558  ;;  %1836 = vmatpush1.bf16.msra.mxu1 %v1835_v46  ;;  %v551_v48 = vpop.permute.xlu0 %550  ;;  %v1345_v54 = vld [vmem:[#allocation2 + $0x320] sm:$0xff]  ;;  %v1350_v55 = vld [vmem:[#allocation2 + $0x348] sm:$0xff] }
 0x1ad   : > { %567 = vst.msk [vmem:[#allocation2 + $0x350] sm:$0xff] %vm482_vm4, %v559_v47  ;;  %557 = vst.msk [vmem:[#allocation2 + $0x328] sm:$0xff] %vm482_vm4, %v551_v48  ;;  %v1787_v62 = vpack.c.bf16 %v1350_v55, %v1345_v54 }
 0x1ae   : > { %1217 = vrot.lane.b32.xlu1 %v2691_v60, %s2084_s25  ;;  %1209 = vrot.lane.b32.xlu0 %v2702_v63, %s2083_s24 }
 0x1b0   : > { %v960_v49 = vpop.permute.xlu1 %959  ;;  %v952_v50 = vpop.permute.xlu0 %951 }
 0x1b1   : > { %968 = vst.msk [vmem:[#allocation2 + $0x360] sm:$0xff] %vm883_vm5, %v960_v49  ;;  %958 = vst.msk [vmem:[#allocation2 + $0x338] sm:$0xff] %vm883_vm5, %v952_v50 }
 0x1b2   : > { %1221 = vrot.lane.b32.xlu1 %v2702_v63, %s2084_s25  ;;  %1219 = vrot.lane.b32.xlu0 %v2688_v59, %s2084_s25 }
 0x1b4   : > { %v696_v4 = vpop.permute.xlu1 %695  ;;  %v685_v6 = vpop.permute.xlu0 %684 }
 0x1b5   : > { %704 = vst.msk [vmem:[#allocation2 + $0x350] sm:$0xff] %vm597_vm6, %v696_v4  ;;  %693 = vst.msk [vmem:[#allocation2 + $0x328] sm:$0xff] %vm597_vm6, %v685_v6 }
 0x1b6   : > { %705 = vst.msk [vmem:[#allocation2 + $0x358] sm:$0xff] %vm599_vm7, %v696_v4  ;;  %694 = vst.msk [vmem:[#allocation2 + $0x330] sm:$0xff] %vm599_vm7, %v685_v6  ;;  %1231 = vrot.lane.b32.xlu1 %v2688_v59, %s2085_s26  ;;  %1229 = vrot.lane.b32.xlu0 %v2691_v60, %s2085_s26 }
 0x1b7   : > { %847 = vst.msk [vmem:[#allocation2 + $0x358] sm:$0xff] %vm740_vm8, %v839_v0  ;;  %836 = vst.msk [vmem:[#allocation2 + $0x330] sm:$0xff] %vm740_vm8, %v828_v42 }
 0x1b8   : > { %v1097_v51 = vpop.permute.xlu1 %1096  ;;  %v1086_v7 = vpop.permute.xlu0 %1085 }
 0x1b9   : > { %1105 = vst.msk [vmem:[#allocation2 + $0x360] sm:$0xff] %vm998_vm9, %v1097_v51  ;;  %1094 = vst.msk [vmem:[#allocation2 + $0x338] sm:$0xff] %vm998_vm9, %v1086_v7 }
 0x1ba   : > { %1106 = vst.msk [vmem:[#allocation2 + $0x368] sm:$0xff] %vm1000_vm10, %v1097_v51  ;;  %1095 = vst.msk [vmem:[#allocation2 + $0x340] sm:$0xff] %vm1000_vm10, %v1086_v7  ;;  %1233 = vrot.lane.b32.xlu0 %v2702_v63, %s2085_s26  ;;  %1384 = vperm.xlu1 %1999, %v1380_v52  }
 0x1bc   : > { %v442_v57 = vpop.permute.xlu1 %441  ;;  %v440_v5 = vpop.permute.xlu0 %439  ;;  %v1346_v59 = vld [vmem:[#allocation2 + $0x328] sm:$0xff]  ;;  %v1351_v60 = vld [vmem:[#allocation2 + $0x350] sm:$0xff] }
 0x1bd   : > { %450 = vst.msk [vmem:[#allocation2 + $0x398] sm:$0xff] %vm339_vm1, %v442_v57  ;;  %448 = vst.msk [vmem:[#allocation2 + $0x370] sm:$0xff] %vm339_vm1, %v440_v5  ;;  %v1785_v61 = vpack.c.bf16 %v1351_v60, %v1346_v59 }
 0x1be   : > { %451 = vst.msk [vmem:[#allocation2 + $0x3a0] sm:$0xff] %vm341_vm2, %v442_v57  ;;  %449 = vst.msk [vmem:[#allocation2 + $0x378] sm:$0xff] %vm341_vm2, %v440_v5  ;;  %1632 = vperm.xlu1 %1999, %v1628_v56   ;;  %1389 = vperm.xlu0 %2000, %v1381_v3   ;;  %v1347_v63 = vld [vmem:[#allocation2 + $0x330] sm:$0xff]  ;;  %v1352_v1 = vld [vmem:[#allocation2 + $0x358] sm:$0xff] }
 0x1bf   : > { %1786 = vmatprep.subr.bf16.mxu0 %v1785_v61  ;;  %v1839_v14 = vpack.c.bf16 %v1352_v1, %v1347_v63 }
 0x1c0   : > { %v843_v9 = vpop.permute.xlu1 %842  ;;  %v841_v10 = vpop.permute.xlu0 %840  ;;  %1788 = vmatpush1.bf16.msra.mxu0 %v1787_v62  ;;  %v1348_v11 = vld [vmem:[#allocation2 + $0x338] sm:$0xff]  ;;  %v1353_v12 = vld [vmem:[#allocation2 + $0x360] sm:$0xff] }
 0x1c1   : > { %852 = vst.msk [vmem:[#allocation2 + $0x3b0] sm:$0xff] %vm742_vm3, %v843_v9  ;;  %850 = vst.msk [vmem:[#allocation2 + $0x388] sm:$0xff] %vm742_vm3, %v841_v10  ;;  %v1837_v13 = vpack.c.bf16 %v1353_v12, %v1348_v11  ;;  %v1244_v11 = vld [vmem:[%s2931_s1 + $0x18] sm:$0xff] }
 0x1c2   : > { %1637 = vperm.xlu1 %1999, %v1629_v8   ;;  %v2838_v8 = vld [vmem:[%s2931_s1] sm:$0xff] }
 0x1c3   : > { %1838 = vmatprep.subr.bf16.mxu1 %v1837_v13 }
 0x1c4   : > { %v563_v15 = vpop.permute.xlu1 %562  ;;  %1840 = vmatpush1.bf16.msra.mxu1 %v1839_v14  ;;  %v561_v16 = vpop.permute.xlu0 %560  ;;  %v1355_v23 = vld [vmem:[#allocation2 + $0x370] sm:$0xff]  ;;  %v1360_v24 = vld [vmem:[#allocation2 + $0x398] sm:$0xff]  ;;  %v2087_v14 = vmov 0.0|0.0  }
 0x1c5   : > { %569 = vst.msk [vmem:[#allocation2 + $0x3a0] sm:$0xff] %vm482_vm4, %v563_v15  ;;  %568 = vst.msk [vmem:[#allocation2 + $0x378] sm:$0xff] %vm482_vm4, %v561_v16  ;;  %v1791_v30 = vpack.c.bf16 %v1360_v24, %v1355_v23 }
 0x1c8   : > { %v964_v17 = vpop.permute.xlu1 %963  ;;  %v962_v18 = vpop.permute.xlu0 %961 }
 0x1c9   : > { %970 = vst.msk [vmem:[#allocation2 + $0x3b0] sm:$0xff] %vm883_vm5, %v964_v17  ;;  %969 = vst.msk [vmem:[#allocation2 + $0x388] sm:$0xff] %vm883_vm5, %v962_v18  ;;  %v2856_v18 = vld [vmem:[%s2931_s1 + $0x10] sm:$0xff] }
 0x1cc   : > { %v700_v19 = vpop.permute.xlu1 %699  ;;  %v698_v20 = vpop.permute.xlu0 %697 }
 0x1cd   : > { %708 = vst.msk [vmem:[#allocation2 + $0x3a0] sm:$0xff] %vm597_vm6, %v700_v19  ;;  %706 = vst.msk [vmem:[#allocation2 + $0x378] sm:$0xff] %vm597_vm6, %v698_v20 }
 0x1ce   : > { %709 = vst.msk [vmem:[#allocation2 + $0x3a8] sm:$0xff] %vm599_vm7, %v700_v19  ;;  %707 = vst.msk [vmem:[#allocation2 + $0x380] sm:$0xff] %vm599_vm7, %v698_v20 }
 0x1cf   : > { %851 = vst.msk [vmem:[#allocation2 + $0x3a8] sm:$0xff] %vm740_vm8, %v843_v9  ;;  %849 = vst.msk [vmem:[#allocation2 + $0x380] sm:$0xff] %vm740_vm8, %v841_v10 }
 0x1d0   : > { %v1101_v21 = vpop.permute.xlu1 %1100  ;;  %v1099_v22 = vpop.permute.xlu0 %1098 }
 0x1d1   : > { %1109 = vst.msk [vmem:[#allocation2 + $0x3b0] sm:$0xff] %vm998_vm9, %v1101_v21  ;;  %1107 = vst.msk [vmem:[#allocation2 + $0x388] sm:$0xff] %vm998_vm9, %v1099_v22 }
 0x1d2   : > { %1110 = vst.msk [vmem:[#allocation2 + $0x3b8] sm:$0xff] %vm1000_vm10, %v1101_v21  ;;  %1108 = vst.msk [vmem:[#allocation2 + $0x390] sm:$0xff] %vm1000_vm10, %v1099_v22 }
 0x1d4   : > { %v455_v25 = vpop.permute.xlu1 %454  ;;  %v453_v26 = vpop.permute.xlu0 %452  ;;  %v1356_v27 = vld [vmem:[#allocation2 + $0x378] sm:$0xff]  ;;  %v1361_v28 = vld [vmem:[#allocation2 + $0x3a0] sm:$0xff] }
 0x1d5   : > { %463 = vst.msk [vmem:[#allocation2 + $0x3e8] sm:$0xff] %vm339_vm1, %v455_v25  ;;  %461 = vst.msk [vmem:[#allocation2 + $0x3c0] sm:$0xff] %vm339_vm1, %v453_v26  ;;  %v1789_v29 = vpack.c.bf16 %v1361_v28, %v1356_v27 }
 0x1d6   : > { %464 = vst.msk [vmem:[#allocation2 + $0x3f0] sm:$0xff] %vm341_vm2, %v455_v25  ;;  %462 = vst.msk [vmem:[#allocation2 + $0x3c8] sm:$0xff] %vm341_vm2, %v453_v26  ;;  %v1357_v31 = vld [vmem:[#allocation2 + $0x380] sm:$0xff]  ;;  %v1362_v32 = vld [vmem:[#allocation2 + $0x3a8] sm:$0xff] }
 0x1d7   : > { %1790 = vmatprep.subr.bf16.mxu0 %v1789_v29  ;;  %v1843_v38 = vpack.c.bf16 %v1362_v32, %v1357_v31 }
 0x1d8   : > { %v856_v33 = vpop.permute.xlu1 %855  ;;  %v854_v34 = vpop.permute.xlu0 %853  ;;  %1792 = vmatpush1.bf16.msra.mxu0 %v1791_v30  ;;  %v1358_v35 = vld [vmem:[#allocation2 + $0x388] sm:$0xff]  ;;  %v1363_v36 = vld [vmem:[#allocation2 + $0x3b0] sm:$0xff] }
 0x1d9   : > { %865 = vst.msk [vmem:[#allocation2 + $0x400] sm:$0xff] %vm742_vm3, %v856_v33  ;;  %863 = vst.msk [vmem:[#allocation2 + $0x3d8] sm:$0xff] %vm742_vm3, %v854_v34  ;;  %v1841_v37 = vpack.c.bf16 %v1363_v36, %v1358_v35 }
 0x1db   : > { %1842 = vmatprep.subr.bf16.mxu1 %v1841_v37 }
 0x1dc   : > { %v573_v39 = vpop.permute.xlu1 %572  ;;  %1844 = vmatpush1.bf16.msra.mxu1 %v1843_v38  ;;  %v571_v40 = vpop.permute.xlu0 %570  ;;  %v1365_v45 = vld [vmem:[#allocation2 + $0x3c0] sm:$0xff]  ;;  %v1370_v46 = vld [vmem:[#allocation2 + $0x3e8] sm:$0xff] }
 0x1dd   : > { %580 = vst.msk [vmem:[#allocation2 + $0x3f0] sm:$0xff] %vm482_vm4, %v573_v39  ;;  %579 = vst.msk [vmem:[#allocation2 + $0x3c8] sm:$0xff] %vm482_vm4, %v571_v40  ;;  %v1795_v6 = vpack.c.bf16 %v1370_v46, %v1365_v45 }
 0x1e0   : > { %v974_v2 = vpop.permute.xlu1 %973  ;;  %v972_v41 = vpop.permute.xlu0 %971 }
 0x1e1   : > { %981 = vst.msk [vmem:[#allocation2 + $0x400] sm:$0xff] %vm883_vm5, %v974_v2  ;;  %980 = vst.msk [vmem:[#allocation2 + $0x3d8] sm:$0xff] %vm883_vm5, %v972_v41 }
 0x1e4   : > { %v713_v0 = vpop.permute.xlu1 %712  ;;  %v711_v42 = vpop.permute.xlu0 %710 }
 0x1e5   : > { %721 = vst.msk [vmem:[#allocation2 + $0x3f0] sm:$0xff] %vm597_vm6, %v713_v0  ;;  %719 = vst.msk [vmem:[#allocation2 + $0x3c8] sm:$0xff] %vm597_vm6, %v711_v42 }
 0x1e6   : > { %722 = vst.msk [vmem:[#allocation2 + $0x3f8] sm:$0xff] %vm599_vm7, %v713_v0  ;;  %720 = vst.msk [vmem:[#allocation2 + $0x3d0] sm:$0xff] %vm599_vm7, %v711_v42 }
 0x1e7   : > { %864 = vst.msk [vmem:[#allocation2 + $0x3f8] sm:$0xff] %vm740_vm8, %v856_v33  ;;  %862 = vst.msk [vmem:[#allocation2 + $0x3d0] sm:$0xff] %vm740_vm8, %v854_v34 }
 0x1e8   : > { %v1114_v43 = vpop.permute.xlu1 %1113  ;;  %v1112_v44 = vpop.permute.xlu0 %1111 }
 0x1e9   : > { %1122 = vst.msk [vmem:[#allocation2 + $0x400] sm:$0xff] %vm998_vm9, %v1114_v43  ;;  %1120 = vst.msk [vmem:[#allocation2 + $0x3d8] sm:$0xff] %vm998_vm9, %v1112_v44 }
 0x1ea   : > { %1123 = vst.msk [vmem:[#allocation2 + $0x408] sm:$0xff] %vm1000_vm10, %v1114_v43  ;;  %1121 = vst.msk [vmem:[#allocation2 + $0x3e0] sm:$0xff] %vm1000_vm10, %v1112_v44 }
 0x1ec   : > { %v858_v47 = vpop.permute.xlu1 %857  ;;  %v457_v48 = vpop.permute.xlu0 %456  ;;  %v1366_v49 = vld [vmem:[#allocation2 + $0x3c8] sm:$0xff]  ;;  %v1371_v50 = vld [vmem:[#allocation2 + $0x3f0] sm:$0xff] }
 0x1ed   : > { %867 = vst.msk [vmem:[#allocation2 + $0x428] sm:$0xff] %vm742_vm3, %v858_v47  ;;  %v1793_v4 = vpack.c.bf16 %v1371_v50, %v1366_v49 }
 0x1ee   : > { %465 = vst.msk [vmem:[#allocation2 + $0x410] sm:$0xff] %vm339_vm1, %v457_v48  ;;  %v1367_v51 = vld [vmem:[#allocation2 + $0x3d0] sm:$0xff]  ;;  %v1372_v7 = vld [vmem:[#allocation2 + $0x3f8] sm:$0xff] }
 0x1ef   : > { %466 = vst.msk [vmem:[#allocation2 + $0x418] sm:$0xff] %vm341_vm2, %v457_v48  ;;  %1794 = vmatprep.subr.bf16.mxu0 %v1793_v4  ;;  %v1847_v3 = vpack.c.bf16 %v1372_v7, %v1367_v51 }
 0x1f0   : > { %v976_v52 = vpop.permute.xlu1 %975  ;;  %v575_v53 = vpop.permute.xlu0 %574  ;;  %1796 = vmatpush1.bf16.msra.mxu0 %v1795_v6  ;;  %v1368_v54 = vld [vmem:[#allocation2 + $0x3d8] sm:$0xff]  ;;  %v1373_v55 = vld [vmem:[#allocation2 + $0x400] sm:$0xff] }
 0x1f1   : > { %982 = vst.msk [vmem:[#allocation2 + $0x428] sm:$0xff] %vm883_vm5, %v976_v52  ;;  %v1845_v56 = vpack.c.bf16 %v1373_v55, %v1368_v54 }
 0x1f2   : > { %581 = vst.msk [vmem:[#allocation2 + $0x418] sm:$0xff] %vm482_vm4, %v575_v53 }
 0x1f3   : > { %1846 = vmatprep.subr.bf16.mxu1 %v1845_v56 }
 0x1f4   : > { %v1116_v57 = vpop.permute.xlu1 %1115  ;;  %1848 = vmatpush1.bf16.msra.mxu1 %v1847_v3  ;;  %v715_v5 = vpop.permute.xlu0 %714 }
 0x1f5   : > { %1124 = vst.msk [vmem:[#allocation2 + $0x428] sm:$0xff] %vm998_vm9, %v1116_v57  ;;  %v1375_v9 = vld [vmem:[#allocation2 + $0x410] sm:$0xff] }
 0x1f6   : > { %1125 = vst.msk [vmem:[#allocation2 + $0x430] sm:$0xff] %vm1000_vm10, %v1116_v57 }
 0x1f7   : > { %723 = vst.msk [vmem:[#allocation2 + $0x418] sm:$0xff] %vm597_vm6, %v715_v5 }
 0x1f8   : > { %724 = vst.msk [vmem:[#allocation2 + $0x420] sm:$0xff] %vm599_vm7, %v715_v5  ;;  %v1135_v59 = vpop.permute.xlu1 %1134  ;;  %v1133_v60 = vpop.permute.xlu0 %1132 }
 0x1f9   : > { %866 = vst.msk [vmem:[#allocation2 + $0x420] sm:$0xff] %vm740_vm8, %v858_v47 }
 0x1fa   : > { %1143 = vst.msk [vmem:[#allocation2 + $0x48] sm:$0xff] %vm1141_vm12, %v1135_v59  ;;  %1142 = vst.msk [vmem:[#allocation2 + $0x20] sm:$0xff] %vm1141_vm12, %v1133_v60 }
 0x1fc   : > { %v1146_v61 = vpop.permute.xlu1 %1145  ;;  %v1137_v62 = vpop.permute.xlu0 %1136  ;;  %v1378_v1 = vld [vmem:[#allocation2 + $0x428] sm:$0xff] }
 0x1fd   : > { %1154 = vst.msk [vmem:[#allocation2 + $0x98] sm:$0xff] %vm1141_vm12, %v1146_v61  ;;  %1144 = vst.msk [vmem:[#allocation2 + $0x70] sm:$0xff] %vm1141_vm12, %v1137_v62  ;;  %1528 = vmatprep.subr.mxu1 %v1378_v1 }
 0x1fe   : > { %v1376_v63 = vld [vmem:[#allocation2 + $0x418] sm:$0xff] }
 0x1ff   : > { %1451 = vmatprep.subr.mxu0 %v1376_v63 }
 0x200   : > { %v1377_v10 = vld [vmem:[#allocation2 + $0x420] sm:$0xff]  ;;  %1452 = vmatpush1.msra.mxu0 %v1375_v9  ;;  %v1150_v12 = vpop.permute.xlu1 %1149  ;;  %v1148_v13 = vpop.permute.xlu0 %1147 }
 0x201   : > { %1529 = vmatpush1.msra.mxu1 %v1377_v10  ;;  %1464 = vmatmul.mubr.f32.vlgmr.msra.gmra.mrb[0].mxu0 %v2838_v8  ;;  %v1249_v15 = vld [vmem:[#allocation2 + $0x20] sm:$0xff]  ;;  %v1254_v16 = vld [vmem:[#allocation2 + $0x48] sm:$0xff]  ;;  %1156 = vst.msk [vmem:[#allocation2 + $0xe8] sm:$0xff] %vm1141_vm12, %v1150_v12  ;;  %1155 = vst.msk [vmem:[#allocation2 + $0xc0] sm:$0xff] %vm1141_vm12, %v1148_v13  ;;  %v2088_v13 = vmov 0.0  }
 0x202   : > { %1541 = vmatmul.mubr.f32.vlgmr.msra.gmra.mrb[0].mxu1 %v2838_v8  ;;  %1849 = vmatprep.subr.bf16.mxu0 %v2087_v14  ;;  %v1850_v17 = vpack.c.bf16 %v1254_v16, %v1249_v15 }
 0x203   : > { %1888 = vmatprep.subr.bf16.mxu1 %v2087_v14  ;;  %1739 = vmatprep.mubr.msk.f32.mxu1 %vm1392_vm11, %v1244_v11 }
 0x204   : > { %1737 = vmatprep.mubr.msk.f32.mxu0 %vm1392_vm11, %v1244_v11  ;;  %1851 = vmatpush1.bf16.msra.mxu0 %v1850_v17  ;;  %v1160_v19 = vpop.permute.xlu1 %1159  ;;  %v1158_v20 = vpop.permute.xlu0 %1157  ;;  %v1259_v21 = vld [vmem:[#allocation2 + $0x70] sm:$0xff]  ;;  %v1264_v22 = vld [vmem:[#allocation2 + $0x98] sm:$0xff] }
 0x205   : > { %1902 = vmatpush1.bf16.msra.mxu1 %v1850_v17  ;;  %1852 = vmatprep.subr.bf16.mxu0 %v2087_v14  ;;  %1167 = vst.msk [vmem:[#allocation2 + $0x138] sm:$0xff] %vm1141_vm12, %v1160_v19  ;;  %1166 = vst.msk [vmem:[#allocation2 + $0x110] sm:$0xff] %vm1141_vm12, %v1158_v20  ;;  %v1853_v23 = vpack.c.bf16 %v1264_v22, %v1259_v21 }
 0x206   : > { %1889 = vmatprep.subr.bf16.mxu1 %v2087_v14  ;;  %1470 = vmatmul.mubr.f32.gmra.mrb[2].mxu0 %v2856_v18 }
 0x207   : > { %1547 = vmatmul.mubr.f32.gmra.mrb[2].mxu1 %v2856_v18  ;;  %1740 = vmatprep.mubr.msk.f32.mxu0 %vm1392_vm11, %v2675_v58 }
 0x208   : > { %1741 = vmatprep.mubr.msk.f32.mxu1 %vm1392_vm11, %v1244_v11  ;;  %1854 = vmatpush1.bf16.msra.mxu0 %v1853_v23  ;;  %v1170_v24 = vpop.permute.xlu1 %1169  ;;  %v1162_v25 = vpop.permute.xlu0 %1161  ;;  %v1269_v26 = vld [vmem:[#allocation2 + $0xc0] sm:$0xff]  ;;  %v1274_v27 = vld [vmem:[#allocation2 + $0xe8] sm:$0xff] }
 0x209   : > { %1903 = vmatpush1.bf16.msra.mxu1 %v1853_v23  ;;  %1855 = vmatprep.subr.bf16.mxu0 %v2087_v14  ;;  %1178 = vst.msk [vmem:[#allocation2 + $0x188] sm:$0xff] %vm1141_vm12, %v1170_v24  ;;  %1168 = vst.msk [vmem:[#allocation2 + $0x160] sm:$0xff] %vm1141_vm12, %v1162_v25  ;;  %v1856_v28 = vpack.c.bf16 %v1274_v27, %v1269_v26 }
 0x20a   : > { %1890 = vmatprep.subr.bf16.mxu1 %v2087_v14 }
 0x20c   : > { %1857 = vmatpush1.bf16.msra.mxu0 %v1856_v28  ;;  %v1174_v58 = vpop.permute.xlu1 %1173  ;;  %v1172_v29 = vpop.permute.xlu0 %1171  ;;  %v1279_v30 = vld [vmem:[#allocation2 + $0x110] sm:$0xff]  ;;  %v1284_v31 = vld [vmem:[#allocation2 + $0x138] sm:$0xff] }
 0x20d   : > { %1904 = vmatpush1.bf16.msra.mxu1 %v1856_v28  ;;  %1858 = vmatprep.subr.bf16.mxu0 %v2087_v14  ;;  %1180 = vst.msk [vmem:[#allocation2 + $0x1d8] sm:$0xff] %vm1141_vm12, %v1174_v58  ;;  %1179 = vst.msk [vmem:[#allocation2 + $0x1b0] sm:$0xff] %vm1141_vm12, %v1172_v29  ;;  %v1859_v32 = vpack.c.bf16 %v1284_v31, %v1279_v30 }
 0x20e   : > { %1891 = vmatprep.subr.bf16.mxu1 %v2087_v14 }
 0x210   : > { %1860 = vmatpush1.bf16.msra.mxu0 %v1859_v32  ;;  %v1184_v33 = vpop.permute.xlu1 %1183  ;;  %v1182_v34 = vpop.permute.xlu0 %1181  ;;  %v1289_v35 = vld [vmem:[#allocation2 + $0x160] sm:$0xff]  ;;  %v1294_v36 = vld [vmem:[#allocation2 + $0x188] sm:$0xff] }
 0x211   : > { %1905 = vmatpush1.bf16.msra.mxu1 %v1859_v32  ;;  %1861 = vmatprep.subr.bf16.mxu0 %v2087_v14  ;;  %1191 = vst.msk [vmem:[#allocation2 + $0x228] sm:$0xff] %vm1141_vm12, %v1184_v33  ;;  %1190 = vst.msk [vmem:[#allocation2 + $0x200] sm:$0xff] %vm1141_vm12, %v1182_v34  ;;  %v1862_v37 = vpack.c.bf16 %v1294_v36, %v1289_v35 }
 0x212   : > { %1892 = vmatprep.subr.bf16.mxu1 %v2087_v14 }
 0x214   : > { %1863 = vmatpush1.bf16.msra.mxu0 %v1862_v37  ;;  %v1194_v38 = vpop.permute.xlu1 %1193  ;;  %v1186_v39 = vpop.permute.xlu0 %1185  ;;  %v1299_v40 = vld [vmem:[#allocation2 + $0x1b0] sm:$0xff]  ;;  %v1304_v2 = vld [vmem:[#allocation2 + $0x1d8] sm:$0xff] }
 0x215   : > { %1906 = vmatpush1.bf16.msra.mxu1 %v1862_v37  ;;  %1864 = vmatprep.subr.bf16.mxu0 %v2087_v14  ;;  %1202 = vst.msk [vmem:[#allocation2 + $0x278] sm:$0xff] %vm1141_vm12, %v1194_v38  ;;  %1192 = vst.msk [vmem:[#allocation2 + $0x250] sm:$0xff] %vm1141_vm12, %v1186_v39  ;;  %v1865_v41 = vpack.c.bf16 %v1304_v2, %v1299_v40 }
 0x216   : > { %1893 = vmatprep.subr.bf16.mxu1 %v2087_v14 }
 0x218   : > { %1866 = vmatpush1.bf16.msra.mxu0 %v1865_v41  ;;  %v1198_v0 = vpop.permute.xlu1 %1197  ;;  %v1196_v42 = vpop.permute.xlu0 %1195  ;;  %v1309_v43 = vld [vmem:[#allocation2 + $0x200] sm:$0xff]  ;;  %v1314_v44 = vld [vmem:[#allocation2 + $0x228] sm:$0xff] }
 0x219   : > { %1907 = vmatpush1.bf16.msra.mxu1 %v1865_v41  ;;  %1867 = vmatprep.subr.bf16.mxu0 %v2087_v14  ;;  %1204 = vst.msk [vmem:[#allocation2 + $0x2c8] sm:$0xff] %vm1141_vm12, %v1198_v0  ;;  %1203 = vst.msk [vmem:[#allocation2 + $0x2a0] sm:$0xff] %vm1141_vm12, %v1196_v42  ;;  %v1868_v45 = vpack.c.bf16 %v1314_v44, %v1309_v43 }
 0x21a   : > { %1894 = vmatprep.subr.bf16.mxu1 %v2087_v14 }
 0x21c   : > { %1869 = vmatpush1.bf16.msra.mxu0 %v1868_v45  ;;  %v1208_v46 = vpop.permute.xlu1 %1207  ;;  %v1206_v47 = vpop.permute.xlu0 %1205  ;;  %v1319_v48 = vld [vmem:[#allocation2 + $0x250] sm:$0xff]  ;;  %v1324_v49 = vld [vmem:[#allocation2 + $0x278] sm:$0xff] }
 0x21d   : > { %1908 = vmatpush1.bf16.msra.mxu1 %v1868_v45  ;;  %1870 = vmatprep.subr.bf16.mxu0 %v2087_v14  ;;  %1215 = vst.msk [vmem:[#allocation2 + $0x318] sm:$0xff] %vm1141_vm12, %v1208_v46  ;;  %1214 = vst.msk [vmem:[#allocation2 + $0x2f0] sm:$0xff] %vm1141_vm12, %v1206_v47  ;;  %v1871_v50 = vpack.c.bf16 %v1324_v49, %v1319_v48 }
 0x21e   : > { %1895 = vmatprep.subr.bf16.mxu1 %v2087_v14 }
 0x220   : > { %1872 = vmatpush1.bf16.msra.mxu0 %v1871_v50  ;;  %v1218_v4 = vpop.permute.xlu1 %1217  ;;  %v1210_v6 = vpop.permute.xlu0 %1209  ;;  %v1329_v51 = vld [vmem:[#allocation2 + $0x2a0] sm:$0xff]  ;;  %v1334_v7 = vld [vmem:[#allocation2 + $0x2c8] sm:$0xff] }
 0x221   : > { %1909 = vmatpush1.bf16.msra.mxu1 %v1871_v50  ;;  %1873 = vmatprep.subr.bf16.mxu0 %v2087_v14  ;;  %1226 = vst.msk [vmem:[#allocation2 + $0x368] sm:$0xff] %vm1141_vm12, %v1218_v4  ;;  %1216 = vst.msk [vmem:[#allocation2 + $0x340] sm:$0xff] %vm1141_vm12, %v1210_v6  ;;  %v1874_v52 = vpack.c.bf16 %v1334_v7, %v1329_v51 }
 0x222   : > { %1896 = vmatprep.subr.bf16.mxu1 %v2087_v14 }
 0x224   : > { %1875 = vmatpush1.bf16.msra.mxu0 %v1874_v52  ;;  %v1222_v53 = vpop.permute.xlu1 %1221  ;;  %v1220_v54 = vpop.permute.xlu0 %1219  ;;  %v1339_v55 = vld [vmem:[#allocation2 + $0x2f0] sm:$0xff]  ;;  %v1344_v56 = vld [vmem:[#allocation2 + $0x318] sm:$0xff] }
 0x225   : > { %1910 = vmatpush1.bf16.msra.mxu1 %v1874_v52  ;;  %1876 = vmatprep.subr.bf16.mxu0 %v2087_v14  ;;  %1228 = vst.msk [vmem:[#allocation2 + $0x3b8] sm:$0xff] %vm1141_vm12, %v1222_v53  ;;  %1227 = vst.msk [vmem:[#allocation2 + $0x390] sm:$0xff] %vm1141_vm12, %v1220_v54  ;;  %v1877_v3 = vpack.c.bf16 %v1344_v56, %v1339_v55 }
 0x226   : > { %1897 = vmatprep.subr.bf16.mxu1 %v2087_v14 }
 0x228   : > { %1878 = vmatpush1.bf16.msra.mxu0 %v1877_v3  ;;  %v1232_v57 = vpop.permute.xlu1 %1231  ;;  %v1230_v5 = vpop.permute.xlu0 %1229  ;;  %v1349_v59 = vld [vmem:[#allocation2 + $0x340] sm:$0xff]  ;;  %v1354_v60 = vld [vmem:[#allocation2 + $0x368] sm:$0xff] }
 0x229   : > { %1911 = vmatpush1.bf16.msra.mxu1 %v1877_v3  ;;  %1879 = vmatprep.subr.bf16.mxu0 %v2087_v14  ;;  %1239 = vst.msk [vmem:[#allocation2 + $0x408] sm:$0xff] %vm1141_vm12, %v1232_v57  ;;  %1238 = vst.msk [vmem:[#allocation2 + $0x3e0] sm:$0xff] %vm1141_vm12, %v1230_v5  ;;  %v1880_v61 = vpack.c.bf16 %v1354_v60, %v1349_v59 }
 0x22a   : > { %1898 = vmatprep.subr.bf16.mxu1 %v2087_v14 }
 0x22c   : > { %1881 = vmatpush1.bf16.msra.mxu0 %v1880_v61  ;;  %v1234_v62 = vpop.permute.xlu0 %1233  ;;  %v1359_v63 = vld [vmem:[#allocation2 + $0x390] sm:$0xff]  ;;  %v1364_v1 = vld [vmem:[#allocation2 + $0x3b8] sm:$0xff] }
 0x22d   : > { %1912 = vmatpush1.bf16.msra.mxu1 %v1880_v61  ;;  %1882 = vmatprep.subr.bf16.mxu0 %v2087_v14  ;;  %1240 = vst.msk [vmem:[#allocation2 + $0x430] sm:$0xff] %vm1141_vm12, %v1234_v62  ;;  %v1883_v9 = vpack.c.bf16 %v1364_v1, %v1359_v63 }
 0x22e   : > { %1899 = vmatprep.subr.bf16.mxu1 %v2087_v14 }
 0x230   : > { %1884 = vmatpush1.bf16.msra.mxu0 %v1883_v9  ;;  %v1369_v10 = vld [vmem:[#allocation2 + $0x3e0] sm:$0xff]  ;;  %v1374_v11 = vld [vmem:[#allocation2 + $0x408] sm:$0xff] }
 0x231   : > { %1913 = vmatpush1.bf16.msra.mxu1 %v1883_v9  ;;  %1885 = vmatprep.subr.bf16.mxu0 %v2087_v14  ;;  %v1886_v12 = vpack.c.bf16 %v1374_v11, %v1369_v10 }
 0x232   : > { %1900 = vmatprep.subr.bf16.mxu1 %v2087_v14 }
 0x234   : > { %1887 = vmatpush1.bf16.msra.mxu0 %v1886_v12  ;;  %v1379_v15 = vld [vmem:[#allocation2 + $0x430] sm:$0xff] }
 0x235   : > { %1914 = vmatpush1.bf16.msra.mxu1 %v1886_v12  ;;  %1605 = vmatprep.subr.mxu0 %v2088_v13 }
 0x236   : > { %1901 = vmatprep.subr.mxu1 %v2088_v13 }
 0x238   : > { %1606 = vmatpush1.msra.mxu0 %v1379_v15 }
 0x239   : > { %1915 = vmatpush1.msra.mxu1 %v1379_v15  ;;  %1618 = vmatmul.mubr.f32.vlgmr.msra.gmra.mrb[4].mxu0 %v2838_v8  ;;  %v1385_v16 = vpop.permute.xlu1 %1384 }
 0x23a   : > { %1623 = vmatmul.mubr.f32.vlgmr.msra.gmra.mrb[4].mxu1 %v2856_v18 }
 0x23d   : > { %v1633_v17 = vpop.permute.xlu1 %1632  ;;  %v1390_v28 = vpop.permute.xlu0 %1389 }
 0x241   : > { %v1638_v58 = vpop.permute.xlu1 %1637 }
 0x2d4   : > { %v1465_v19 = vpop.f32.mrb[0].mxu0 }
 0x2d5   : > { %v1542_v14 = vpop.f32.mrb[0].mxu1  ;;  %v1466_v20 = vadd.f32 %v1465_v19, %v1385_v16  ;;  %v1467_v22 = vpop.f32.mrb[1].mxu0 }
 0x2d6   : > { %v1543_v21 = vadd.f32 %v1542_v14, %v1385_v16  ;;  %v1544_v23 = vpop.f32.mrb[1].mxu1  ;;  %v1468_v24 = vadd.f32 %v1467_v22, %v1385_v16 }
 0x2d7   : > { %v1545_v25 = vadd.f32 %v1544_v23, %v1385_v16  ;;  %v1640_v8 = vmul.f32 %v1633_v17, %v1466_v20 }
 0x2d8   : > { %v1642_v18 = vmul.f32 %v1633_v17, %v1543_v21  ;;  %v1641_v26 = vmul.f32 %v1633_v17, %v1468_v24 }
 0x2d9   : > { %v1643_v27 = vmul.f32 %v1633_v17, %v1545_v25  ;;  %1650 = vst [vmem:[%s2915_s20] sm:$0xff] %v1640_v8  ;;  %v1471_v29 = vpop.f32.mrb[2].mxu0 }
 0x2da   : > { %1652 = vst [vmem:[%s2915_s20 + $0x10] sm:$0xff] %v1642_v18  ;;  %1651 = vst [vmem:[%s2915_s20 + $0x8] sm:$0xff] %v1641_v26  ;;  %v1548_v30 = vpop.f32.mrb[2].mxu1  ;;  %v1472_v32 = vadd.f32 %v1471_v29, %v1390_v28  ;;  %v1473_v34 = vpop.f32.mrb[3].mxu0 }
 0x2db   : > { %1653 = vst [vmem:[%s2915_s20 + $0x18] sm:$0xff] %v1643_v27  ;;  %v1550_v31 = vpop.f32.mrb[3].mxu1  ;;  %v1549_v33 = vadd.f32 %v1548_v30, %v1390_v28  ;;  %v1474_v36 = vadd.f32 %v1473_v34, %v1390_v28 }
 0x2dc   : > { %v1551_v35 = vadd.f32 %v1550_v31, %v1390_v28  ;;  %v1645_v37 = vmul.f32 %v1638_v58, %v1472_v32 }
 0x2dd   : > { %v1647_v38 = vmul.f32 %v1638_v58, %v1549_v33  ;;  %v1646_v39 = vmul.f32 %v1638_v58, %v1474_v36 }
 0x2de   : > { %v1648_v40 = vmul.f32 %v1638_v58, %v1551_v35  ;;  %1655 = vst [vmem:[%s2915_s20 + $0x28] sm:$0xff] %v1645_v37 }
 0x2df   : > { %1657 = vst [vmem:[%s2915_s20 + $0x38] sm:$0xff] %v1647_v38  ;;  %1656 = vst [vmem:[%s2915_s20 + $0x30] sm:$0xff] %v1646_v39 }
 0x2e0   : > { %1658 = vst [vmem:[%s2915_s20 + $0x40] sm:$0xff] %v1648_v40 }
 0x30c   : > { %v1619_v2 = vpop.f32.mrb[4].mxu0 }
 0x30d   : > { %v1624_v41 = vpop.f32.mrb[4].mxu1  ;;  %v1620_v0 = vadd.f32 %v1619_v2, %v1385_v16  ;;  %v1621_v43 = vpop.f32.mrb[5].mxu0 }
 0x30e   : > { %v1625_v42 = vadd.f32 %v1624_v41, %v1390_v28  ;;  %v1626_v44 = vpop.f32.mrb[5].mxu1 }
 0x30f   : > { %v1644_v45 = vmul.f32 %v1633_v17, %v1620_v0 }
 0x310   : > { %v1649_v46 = vmul.f32 %v1638_v58, %v1625_v42 }
 0x311   : > { %1654 = vst [vmem:[%s2915_s20 + $0x20] sm:$0xff] %v1644_v45 }
 0x312   : > { %1659 = vst [vmem:[%s2915_s20 + $0x48] sm:$0xff] %v1649_v46 }
 0x313 PF: > { %s14_s15 = sadd.s32 1, %s2013_s15  }
 0x314   : > { %p11_p4 = scmp.ge.s32.totalorder %s14_s15, 4  }
 0x316   :  { %13 = sbr.rel (!%p11_p4) target bundleno = 1 (0x1), region = 69 }

</bundles_post_ra>
